<compile_context>
chip_gen: v7x
topology: tpu7x:2x2x1
jax: 0.10.0
libtpu: 0.0.40
codegen_flags: <defaults>
</compile_context>

<pallas_src>
import jax
import jax.numpy as jnp
from jax import lax
from jax.experimental import pallas as pl
from jax.experimental.pallas import tpu as pltpu

HIDDEN = 50        # logical hidden width, matches nn.Linear(F, 50)
HIDDEN_PAD = 64    # zero-padded hidden width (sublane friendly)
OUT_PAD = 128      # final-layer weight padded to a full MXU/lane tile (col 0 is real)
_LANE = 128


def _round_up(x, m):
    return (x + m - 1) // m * m


def mlp_kernel(x_ref, w1_ref, b1_ref, w2_ref, b2_ref, w3_ref, b3_ref, out_ref):
    """Fused 3-layer MLP on one (TB, F) batch tile.

    x_ref:  (TB, F)   f32  (cast to bf16 in-kernel)
    w1_ref: (F, Hp)   bf16    b1_ref: (1, Hp) f32
    w2_ref: (Hp, Hp)  bf16    b2_ref: (1, Hp) f32
    w3_ref: (Hp, 128) f32  (column 0 = real w3, rest zero)
    b3_ref: (1, 1)    f32  SMEM scalar
    out_ref:(TB, 1)   f32
    """
    # In-kernel bf16 cast: HBM only ever sees x once, in f32; VPU has huge slack here.
    x = x_ref[...].astype(jnp.bfloat16)

    h1 = jnp.dot(x, w1_ref[...], preferred_element_type=jnp.float32) + b1_ref[...]
    h1 = jnp.maximum(h1, 0.0).astype(jnp.bfloat16)                    # (TB, Hp)

    h2 = jnp.dot(h1, w2_ref[...], preferred_element_type=jnp.float32) + b2_ref[...]
    h2 = jnp.maximum(h2, 0.0)                                         # (TB, Hp) f32

    # Final layer on the MXU with a lane-padded RHS: no XLU transpose of h2, no
    # narrow-N lowering edge case.  Slice lane 0 and store the thin (TB,1) block.
    y = jnp.dot(h2, w3_ref[...], preferred_element_type=jnp.float32)  # (TB, 128)
    out_ref[...] = y[:, :1] + b3_ref[0, 0]


def _pick_batch_tile(batch, in_features, hidden_pad,
                     tile_budget_bytes=24 * 1024 * 1024, tb_cap=8192):
    """Derive the batch tile from a VMEM budget (lane padding accounted for)."""
    f_pad = _round_up(in_features, _LANE)
    h_pad = _round_up(hidden_pad, _LANE)
    bytes_per_row = (
        2 * f_pad * 4            # double-buffered f32 x tile (lane-padded)
        + 2 * _LANE * 4          # double-buffered (tb, 1) f32 output tile (lane-padded)
        + h_pad * (4 + 2 + 4)    # h1 f32 / h1 bf16 / h2 f32 intermediates
        + _LANE * 4              # (tb, 128) final-layer matmul result
    )
    tb = max(8, min(tb_cap, tile_budget_bytes // bytes_per_row))
    tb = min(tb, batch)
    # Keep >= 2 grid steps when feasible so both v7x TensorCores get work.
    if batch >= 16:
        n_steps = max(2, pl.cdiv(batch, tb))
        tb = pl.cdiv(batch, n_steps)
    if tb != batch:
        tb = _round_up(tb, 8)    # sublane-aligned batch tile (ragged last block is fine)
    return tb


def neural_network_forward(x, kernel_params):
    """x: (B, ...) flattened to (B, F) like nn.Flatten(start_dim=1). Returns (B, 1) f32."""
    w1p, b1p, w2p, b2p, w3p, b3p = kernel_params
    B = x.shape[0]
    x2d = x.reshape(B, -1).astype(jnp.float32)     # flatten; stays f32 (cast happens in-kernel)
    F = x2d.shape[1]
    Hp = w1p.shape[1]
    assert w1p.shape[0] == F

    tb = _pick_batch_tile(B, F, Hp)
    grid = (pl.cdiv(B, tb),)

    flops = 2 * B * (F * Hp + Hp * Hp + Hp)
    bytes_accessed = (B * F * 4 + B * 4                      # f32 x stream + f32 logits
                      + (w1p.size + w2p.size) * 2            # resident bf16 weights
                      + (b1p.size + b2p.size) * 4
                      + (w3p.size + b3p.size) * 4)

    out = pl.pallas_call(
        mlp_kernel,
        out_shape=jax.ShapeDtypeStruct((B, 1), jnp.float32),
        grid=grid,
        in_specs=[
            pl.BlockSpec((tb, F), lambda i: (i, 0)),         # streamed batch tile (f32)
            pl.BlockSpec((F, Hp), lambda i: (0, 0)),         # weights/biases: constant block
            pl.BlockSpec((1, Hp), lambda i: (0, 0)),         #   index -> stay resident in VMEM
            pl.BlockSpec((Hp, Hp), lambda i: (0, 0)),
            pl.BlockSpec((1, Hp), lambda i: (0, 0)),
            pl.BlockSpec((Hp, OUT_PAD), lambda i: (0, 0)),
            pl.BlockSpec(memory_space=pltpu.MemorySpace.SMEM),   # b3 scalar in SMEM
        ],
        out_specs=pl.BlockSpec((tb, 1), lambda i: (i, 0)),
        compiler_params=pltpu.CompilerParams(
            dimension_semantics=("parallel",),               # shard batch across TCs (v7x)
            vmem_limit_bytes=32 * 1024 * 1024),              # raise v5e's 16 MiB default
        cost_estimate=pl.CostEstimate(
            flops=flops, transcendentals=0, bytes_accessed=bytes_accessed),
    )(x2d, w1p, b1p, w2p, b2p, w3p, b3p)

    return out


def init_params(key, in_features, hidden=HIDDEN):
    """PyTorch-equivalent init (Uniform(-1/sqrt(fan_in), 1/sqrt(fan_in))).

    Weights stored as (in, out) so the kernel computes x @ W; biases as (1, out).
    """
    ks = jax.random.split(key, 6)

    def lin(kw, kb, fan_in, fan_out):
        bound = 1.0 / jnp.sqrt(jnp.float32(fan_in))
        w = jax.random.uniform(kw, (fan_in, fan_out), jnp.float32, -bound, bound)
        b = jax.random.uniform(kb, (1, fan_out), jnp.float32, -bound, bound)
        return w, b

    w1, b1 = lin(ks[0], ks[1], in_features, hidden)
    w2, b2 = lin(ks[2], ks[3], hidden, hidden)
    w3, b3 = lin(ks[4], ks[5], hidden, 1)
    return (w1, b1, w2, b2, w3, b3)


def pad_and_cast_params(params, hidden_pad=HIDDEN_PAD, out_pad=OUT_PAD):
    """Zero-pad hidden 50->64 (and w3 lanes 1->128), cast w1/w2 to bf16.

    Padding is numerically transparent: padded hidden units see zero weight and zero
    bias, stay exactly 0 through ReLU, and contribute nothing downstream; padded w3
    lanes are never read (lane 0 is sliced out in the kernel).
    """
    w1, b1, w2, b2, w3, b3 = params
    in_features, hidden = w1.shape

    w1p = jnp.zeros((in_features, hidden_pad), jnp.float32).at[:, :hidden].set(w1)
    b1p = jnp.zeros((1, hidden_pad), jnp.float32).at[:, :hidden].set(b1)
    w2p = jnp.zeros((hidden_pad, hidden_pad), jnp.float32).at[:hidden, :hidden].set(w2)
    b2p = jnp.zeros((1, hidden_pad), jnp.float32).at[:, :hidden].set(b2)
    w3p = jnp.zeros((hidden_pad, out_pad), jnp.float32).at[:hidden, :1].set(w3)
    b3p = b3.reshape(1, 1).astype(jnp.float32)

    return (w1p.astype(jnp.bfloat16), b1p,
            w2p.astype(jnp.bfloat16), b2p,
            w3p, b3p)


if __name__ == "__main__":
    # len(acs_data_df.columns) is data-dependent; pick a small synthetic width.
    IN_FEATURES = 32
    BATCH = 2048          # -> two 1024-row grid steps (exercises pipeline + v7x 2-step rule)

    key = jax.random.PRNGKey(0)
    k_x, k_p = jax.random.split(key)

    x = jax.random.normal(k_x, (BATCH, IN_FEATURES), dtype=jnp.float32)
    params = init_params(k_p, IN_FEATURES)
    kernel_params = pad_and_cast_params(params)

    out = neural_network_forward(x, kernel_params)
    out = jax.block_until_ready(out)

    # Pure-JAX reference with the same bf16 rounding of x / W1 / W2 / h1 as the kernel.
    w1, b1, w2, b2, w3, b3 = params
    hi = lax.Precision.HIGHEST
    bf = lambda a: a.astype(jnp.bfloat16).astype(jnp.float32)
    xr = bf(x.reshape(BATCH, -1))
    h1 = jnp.maximum(jnp.dot(xr, bf(w1), precision=hi) + b1, 0.0)
    h2 = jnp.maximum(jnp.dot(bf(h1), bf(w2), precision=hi) + b2, 0.0)
    ref = jnp.dot(h2, w3, precision=hi) + b3

    assert out.shape == (BATCH, 1)
    assert jnp.allclose(out, ref, atol=5e-3, rtol=5e-3), float(jnp.max(jnp.abs(out - ref)))

    print("KERNEL_OK")
</pallas_src>

<mosaic_0001>
module attributes {stable_mosaic.version = 11 : i64} {
  func.func @mlp_kernel(%arg0: i32, %arg1: memref<1024x32xf32, #tpu.memory_space<vmem>>, %arg2: memref<32x64xbf16, #tpu.memory_space<vmem>>, %arg3: memref<1x64xf32, #tpu.memory_space<vmem>>, %arg4: memref<64x64xbf16, #tpu.memory_space<vmem>>, %arg5: memref<1x64xf32, #tpu.memory_space<vmem>>, %arg6: memref<64x128xf32, #tpu.memory_space<vmem>>, %arg7: memref<1x1xf32, #tpu.memory_space<smem>>, %arg8: memref<1024x1xf32, #tpu.memory_space<vmem>>) attributes {dimension_semantics = [#tpu.dimension_semantics<parallel>], iteration_bounds = array<i64: 2>, scalar_prefetch = 0 : i64, scratch_operands = 0 : i64, tpu.core_type = #tpu.core_type<tc>, window_params = [{transform_indices = @transform_0, window_bounds = array<i64: 1024, 32>}, {pipeline_mode = #tpu.pipeline_mode<synchronous>, transform_indices = @transform_1, window_bounds = array<i64: 32, 64>}, {pipeline_mode = #tpu.pipeline_mode<synchronous>, transform_indices = @transform_2, window_bounds = array<i64: 1, 64>}, {pipeline_mode = #tpu.pipeline_mode<synchronous>, transform_indices = @transform_3, window_bounds = array<i64: 64, 64>}, {pipeline_mode = #tpu.pipeline_mode<synchronous>, transform_indices = @transform_4, window_bounds = array<i64: 1, 64>}, {pipeline_mode = #tpu.pipeline_mode<synchronous>, transform_indices = @transform_5, window_bounds = array<i64: 64, 128>}, {transform_indices = @transform_6, window_bounds = array<i64: 1, 1>}, {transform_indices = @transform_7, window_bounds = array<i64: 1024, 1>}]} {
    %c0 = arith.constant 0 : index
    %c0_0 = arith.constant 0 : index
    %0 = vector.load %arg1[%c0, %c0_0] : memref<1024x32xf32, #tpu.memory_space<vmem>>, vector<1024x32xf32>
    %1 = arith.truncf %0 : vector<1024x32xf32> to vector<1024x32xbf16>
    %c0_1 = arith.constant 0 : index
    %c0_2 = arith.constant 0 : index
    %2 = vector.load %arg2[%c0_1, %c0_2] : memref<32x64xbf16, #tpu.memory_space<vmem>>, vector<32x64xbf16>
    %cst = arith.constant dense<0.000000e+00> : vector<1024x64xf32>
    %3 = tpu.matmul %1, %2, %cst {dimension_numbers = #tpu.dot_dimension_numbers<[1], [0], [0], [1], [0, 0, 1, 1], [], []>} : vector<1024x32xbf16>, vector<32x64xbf16>, vector<1024x64xf32> -> vector<1024x64xf32>
    %c0_3 = arith.constant 0 : index
    %c0_4 = arith.constant 0 : index
    %4 = vector.load %arg3[%c0_3, %c0_4] : memref<1x64xf32, #tpu.memory_space<vmem>>, vector<1x64xf32>
    %5 = vector.broadcast %4 : vector<1x64xf32> to vector<1024x64xf32>
    %6 = arith.addf %3, %5 : vector<1024x64xf32>
    %cst_5 = arith.constant 0.000000e+00 : f32
    %7 = vector.broadcast %cst_5 : f32 to vector<1024x64xf32>
    %8 = arith.maximumf %6, %7 : vector<1024x64xf32>
    %9 = arith.truncf %8 : vector<1024x64xf32> to vector<1024x64xbf16>
    %c0_6 = arith.constant 0 : index
    %c0_7 = arith.constant 0 : index
    %10 = vector.load %arg4[%c0_6, %c0_7] : memref<64x64xbf16, #tpu.memory_space<vmem>>, vector<64x64xbf16>
    %cst_8 = arith.constant dense<0.000000e+00> : vector<1024x64xf32>
    %11 = tpu.matmul %9, %10, %cst_8 {dimension_numbers = #tpu.dot_dimension_numbers<[1], [0], [0], [1], [0, 0, 1, 1], [], []>} : vector<1024x64xbf16>, vector<64x64xbf16>, vector<1024x64xf32> -> vector<1024x64xf32>
    %c0_9 = arith.constant 0 : index
    %c0_10 = arith.constant 0 : index
    %12 = vector.load %arg5[%c0_9, %c0_10] : memref<1x64xf32, #tpu.memory_space<vmem>>, vector<1x64xf32>
    %13 = vector.broadcast %12 : vector<1x64xf32> to vector<1024x64xf32>
    %14 = arith.addf %11, %13 : vector<1024x64xf32>
    %cst_11 = arith.constant 0.000000e+00 : f32
    %15 = vector.broadcast %cst_11 : f32 to vector<1024x64xf32>
    %16 = arith.maximumf %14, %15 : vector<1024x64xf32>
    %c0_12 = arith.constant 0 : index
    %c0_13 = arith.constant 0 : index
    %17 = vector.load %arg6[%c0_12, %c0_13] : memref<64x128xf32, #tpu.memory_space<vmem>>, vector<64x128xf32>
    %cst_14 = arith.constant dense<0.000000e+00> : vector<1024x128xf32>
    %18 = tpu.matmul %16, %17, %cst_14 {dimension_numbers = #tpu.dot_dimension_numbers<[1], [0], [0], [1], [0, 0, 1, 1], [], []>} : vector<1024x64xf32>, vector<64x128xf32>, vector<1024x128xf32> -> vector<1024x128xf32>
    %19 = vector.extract_strided_slice %18 {offsets = [0, 0], sizes = [1024, 1], strides = [1, 1]} : vector<1024x128xf32> to vector<1024x1xf32>
    %c0_15 = arith.constant 0 : index
    %c0_16 = arith.constant 0 : index
    %20 = memref.load %arg7[%c0_15, %c0_16] : memref<1x1xf32, #tpu.memory_space<smem>>
    %21 = vector.broadcast %20 : f32 to vector<1024x1xf32>
    %22 = arith.addf %19, %21 : vector<1024x1xf32>
    %c0_17 = arith.constant 0 : index
    %c0_18 = arith.constant 0 : index
    %23 = vector.load %arg8[%c0_17, %c0_18] : memref<1024x1xf32, #tpu.memory_space<vmem>>, vector<1024x1xf32>
    tpu.vector_store %arg8[%c0_17, %c0_18], %22 {strides = array<i32>} : memref<1024x1xf32, #tpu.memory_space<vmem>>, vector<1024x1xf32>,
    return
  }
  func.func @transform_0(%arg0: i32) -> (i32, i32) {
    %c0_i32 = arith.constant 0 : i32
    %c0_i32_0 = arith.constant 0 : i32
    return %arg0, %c0_i32 : i32, i32
  }
  func.func @transform_1(%arg0: i32) -> (i32, i32) {
    %c0_i32 = arith.constant 0 : i32
    %c0_i32_0 = arith.constant 0 : i32
    %c0_i32_1 = arith.constant 0 : i32
    return %c0_i32, %c0_i32_0 : i32, i32
  }
  func.func @transform_2(%arg0: i32) -> (i32, i32) {
    %c0_i32 = arith.constant 0 : i32
    %c0_i32_0 = arith.constant 0 : i32
    %c0_i32_1 = arith.constant 0 : i32
    return %c0_i32, %c0_i32_0 : i32, i32
  }
  func.func @transform_3(%arg0: i32) -> (i32, i32) {
    %c0_i32 = arith.constant 0 : i32
    %c0_i32_0 = arith.constant 0 : i32
    %c0_i32_1 = arith.constant 0 : i32
    return %c0_i32, %c0_i32_0 : i32, i32
  }
  func.func @transform_4(%arg0: i32) -> (i32, i32) {
    %c0_i32 = arith.constant 0 : i32
    %c0_i32_0 = arith.constant 0 : i32
    %c0_i32_1 = arith.constant 0 : i32
    return %c0_i32, %c0_i32_0 : i32, i32
  }
  func.func @transform_5(%arg0: i32) -> (i32, i32) {
    %c0_i32 = arith.constant 0 : i32
    %c0_i32_0 = arith.constant 0 : i32
    %c0_i32_1 = arith.constant 0 : i32
    return %c0_i32, %c0_i32_0 : i32, i32
  }
  func.func @transform_6(%arg0: i32) -> (i32, i32) {
    %c0_i32 = arith.constant 0 : i32
    %c0_i32_0 = arith.constant 0 : i32
    %c0_i32_1 = arith.constant 0 : i32
    return %c0_i32, %c0_i32_0 : i32, i32
  }
  func.func @transform_7(%arg0: i32) -> (i32, i32) {
    %c0_i32 = arith.constant 0 : i32
    %c0_i32_0 = arith.constant 0 : i32
    return %arg0, %c0_i32 : i32, i32
  }
}

</mosaic_0001>

<bundles_post_ra>
// kernel: tpu_custom_call.1
= control target key start
LH: loop header
LB: loop body
LE: loop exit
PB: predicated region body
PF: predicated region fallthrough
CT: control target
= control target key end

     0   :  { %s4853_s26 = smov 0   ;;  %s6049_s0 = inlined_call_operand.vmem [shape: f32[2048,32], index: 0, kind: input, shape index: {}]   ;;  %s6050_s1 = inlined_call_operand.vmem [shape: bf16[32,64], index: 1, kind: input, shape index: {}]   ;;  %s6051_s2 = inlined_call_operand.vmem [shape: f32[1,64], index: 2, kind: input, shape index: {}]   ;;  %s6052_s3 = inlined_call_operand.vmem [shape: bf16[64,64], index: 3, kind: input, shape index: {}]   ;;  %s6053_s4 = inlined_call_operand.vmem [shape: f32[1,64], index: 4, kind: input, shape index: {}]   ;;  %s6054_s5 = inlined_call_operand.vmem [shape: f32[64,128], index: 5, kind: input, shape index: {}]   ;;  %s6055_s6 = inlined_call_operand.<no memory space> [shape: f32[1,1], index: 6, kind: input, shape index: {}]   ;;  %s6056_s7 = inlined_call_operand.vmem [shape: f32[2048,1], index: 7, kind: output, shape index: {}]  }
   0x1   :  { %12 = sst [smem:[#allocation2]] %s6055_s6 }
   0x2 LB: > { %s3746_s27 = sadd.s32 4294967295, %s4808_s26   ;;  %p3750_p0 = scmp.ge.s32.totalorder %s4808_s26, 1  ;;  %s4808_s26 = sphi %s4853_s26, %s18_s26  }
   0x3   : > { %p239_p1 = scmp.lt.s32.totalorder %s4808_s26, 3 }
   0x5   : > { %p240_p2 = pnand %p3750_p0, %p239_p1 }
   0x6   : > { %v4795_v0 = vld [vmem:[%s6050_s1] sm:$0xff] (!%p240_p2)   ;;  %s3751_s6 = sshll.u32 (!%p240_p2), %s3746_s27, 7  ;;  %v4796_v1 = vld [vmem:[%s6050_s1 + $0x8] sm:$0xff] (!%p240_p2)   ;;  %vm499_vm0 = vcmask (!%p240_p2), 261120   ;;  %v4799_v36 = vld [vmem:[%s6052_s3 + $0x10] sm:$0xff] (!%p240_p2)   ;;  %vm1468_vm1 = vcmask (!%p240_p2), 523264  }
   0x7   : > { %243 = sbr.rel (%p240_p2) target bundleno = 930 (0x3a2), region = 48  ;;  %p272_p3 = scmp.lt.s32.totalorder (!%p240_p2), %s3751_s6, 255  ;;  %4291 = vmatprep.subr.bf16.mxu0 (!%p240_p2), %v4795_v0  ;;  %4783 = vmatprep.subr.bf16.mxu1 (!%p240_p2), %v4795_v0  ;;  %v4797_v2 = vld [vmem:[%s6052_s3] sm:$0xff] (!%p240_p2)   ;;  %v4798_v31 = vld [vmem:[%s6052_s3 + $0x8] sm:$0xff] (!%p240_p2)   ;;  %v4800_v47 = vld [vmem:[%s6052_s3 + $0x18] sm:$0xff] (!%p240_p2)   ;;  %vm3561_vm2 = vcmask (!%p240_p2), 7168  }
   0x8   : > { %4292 = vmatpush3.bf16.msra.mxu0 (!%p240_p2), %v4795_v0  ;;  %4785 = vmatpush3.bf16.msra.mxu1 (!%p240_p2), %v4795_v0  ;;  %s3431_s20 = sld [smem:[#allocation2]] (!%p240_p2) }
   0x9   : > { %4293 = vmatprep.subr.bf16.mxu0 (!%p240_p2), %v4796_v1  ;;  %4784 = vmatprep.subr.bf16.mxu1 (!%p240_p2), %v4796_v1 }
   0xc   : > { %4294 = vmatpush3.bf16.msra.mxu0 (!%p240_p2), %v4796_v1  ;;  %4786 = vmatpush3.bf16.msra.mxu1 (!%p240_p2), %v4796_v1 }
   0xd   : > { %4423 = vmatprep.subr.bf16.mxu1 (!%p240_p2), %v4797_v2 }
   0xe   : > { %s6058_s6 = smov (!%p272_p3, %s3751_s6), 255 }
   0xf   : > { %s3752_s11 = sshll.u32 %s6058_s6, 3 }
  0x10   : > { %s4878_s14 = scalar_lea.vmem %s6049_s0, %s3752_s11  ;;  %s5626_s23 = scalar_lea.vmem %s6056_s7, %s3752_s11 }
  0x11   : > { %v284_v3 = vld [vmem:[%s4878_s14] sm:$0xff]  ;;  %v285_v4 = vld [vmem:[%s4878_s14 + $0x8] sm:$0xff]  ;;  %v286_v5 = vld [vmem:[%s4878_s14 + $0x10] sm:$0xff] }
  0x12   : > { %v412_v6 = vpack.c.bf16 %v285_v4, %v284_v3  ;;  %v287_v7 = vld [vmem:[%s4878_s14 + $0x18] sm:$0xff]  ;;  %v288_v8 = vld [vmem:[%s4878_s14 + $0x20] sm:$0xff]  ;;  %v289_v9 = vld [vmem:[%s4878_s14 + $0x28] sm:$0xff] }
  0x13   : > { %v413_v10 = vpack.c.bf16 %v287_v7, %v286_v5  ;;  %v414_v11 = vpack.c.bf16 %v289_v9, %v288_v8  ;;  %v290_v12 = vld [vmem:[%s4878_s14 + $0x30] sm:$0xff]  ;;  %v291_v13 = vld [vmem:[%s4878_s14 + $0x38] sm:$0xff]  ;;  %v292_v14 = vld [vmem:[%s4878_s14 + $0x40] sm:$0xff] }
  0x14   : > { %4295 = vmatprep.mubr.msk.bf16.mxu0 %vm499_vm0, %v412_v6  ;;  %v293_v15 = vld [vmem:[%s4878_s14 + $0x48] sm:$0xff]  ;;  %v415_v16 = vpack.c.bf16 %v291_v13, %v290_v12  ;;  %v294_v18 = vld [vmem:[%s4878_s14 + $0x50] sm:$0xff]  ;;  %v295_v19 = vld [vmem:[%s4878_s14 + $0x58] sm:$0xff] }
  0x15   : > { %4296 = vmatmul.mubr.msk.bf16.vlgmr.msra.gmra.mrb[0].mxu0 %vm499_vm0, %v413_v10  ;;  %v416_v17 = vpack.c.bf16 %v293_v15, %v292_v14  ;;  %v296_v20 = vld [vmem:[%s4878_s14 + $0x60] sm:$0xff]  ;;  %v297_v21 = vld [vmem:[%s4878_s14 + $0x68] sm:$0xff]  ;;  %v417_v22 = vpack.c.bf16 %v295_v19, %v294_v18  ;;  %v350_v25 = vld [vmem:[%s4878_s14 + $0x210] sm:$0xff] }
  0x16   : > { %4299 = vmatprep.mubr.msk.bf16.mxu0 %vm499_vm0, %v414_v11  ;;  %v348_v23 = vld [vmem:[%s4878_s14 + $0x200] sm:$0xff]  ;;  %v349_v24 = vld [vmem:[%s4878_s14 + $0x208] sm:$0xff]  ;;  %v418_v26 = vpack.c.bf16 %v297_v21, %v296_v20  ;;  %v351_v28 = vld [vmem:[%s4878_s14 + $0x218] sm:$0xff] }
  0x17   : > { %v444_v27 = vpack.c.bf16 %v349_v24, %v348_v23  ;;  %v445_v29 = vpack.c.bf16 %v351_v28, %v350_v25  ;;  %v352_v30 = vld [vmem:[%s4878_s14 + $0x220] sm:$0xff]  ;;  %v353_v32 = vld [vmem:[%s4878_s14 + $0x228] sm:$0xff]  ;;  %v298_v33 = vld [vmem:[%s4878_s14 + $0x70] sm:$0xff] }
  0x18   : > { %v299_v34 = vld [vmem:[%s4878_s14 + $0x78] sm:$0xff]  ;;  %v446_v35 = vpack.c.bf16 %v353_v32, %v352_v30  ;;  %v300_v37 = vld [vmem:[%s4878_s14 + $0x80] sm:$0xff]  ;;  %v354_v38 = vld [vmem:[%s4878_s14 + $0x230] sm:$0xff] }
  0x19   : > { %4359 = vmatprep.mubr.msk.bf16.mxu1 %vm499_vm0, %v444_v27  ;;  %v355_v39 = vld [vmem:[%s4878_s14 + $0x238] sm:$0xff]  ;;  %v301_v40 = vld [vmem:[%s4878_s14 + $0x88] sm:$0xff]  ;;  %v356_v41 = vld [vmem:[%s4878_s14 + $0x240] sm:$0xff]  ;;  %v419_v43 = vpack.c.bf16 %v299_v34, %v298_v33 }
  0x1a   : > { %4360 = vmatmul.mubr.msk.bf16.vlgmr.msra.gmra.mrb[0].mxu1 %vm499_vm0, %v445_v29  ;;  %v357_v42 = vld [vmem:[%s4878_s14 + $0x248] sm:$0xff]  ;;  %v447_v44 = vpack.c.bf16 %v355_v39, %v354_v38  ;;  %v420_v45 = vpack.c.bf16 %v301_v40, %v300_v37  ;;  %v302_v48 = vld [vmem:[%s4878_s14 + $0x90] sm:$0xff]  ;;  %v303_v49 = vld [vmem:[%s4878_s14 + $0x98] sm:$0xff] }
  0x1b   : > { %4424 = vmatpush3.bf16.msra.mxu1 %v4797_v2  ;;  %4363 = vmatprep.mubr.msk.bf16.mxu1 %vm499_vm0, %v446_v35  ;;  %v448_v46 = vpack.c.bf16 %v357_v42, %v356_v41  ;;  %v304_v50 = vld [vmem:[%s4878_s14 + $0xa0] sm:$0xff]  ;;  %v358_v51 = vld [vmem:[%s4878_s14 + $0x250] sm:$0xff]  ;;  %v359_v52 = vld [vmem:[%s4878_s14 + $0x258] sm:$0xff]  ;;  %v421_v56 = vpack.c.bf16 %v303_v49, %v302_v48 }
  0x1c   : > { %4425 = vmatprep.subr.bf16.mxu1 %v4798_v31  ;;  %v305_v53 = vld [vmem:[%s4878_s14 + $0xa8] sm:$0xff]  ;;  %v360_v54 = vld [vmem:[%s4878_s14 + $0x260] sm:$0xff]  ;;  %v449_v57 = vpack.c.bf16 %v359_v52, %v358_v51  ;;  %v306_v60 = vld [vmem:[%s4878_s14 + $0xb0] sm:$0xff] }
  0x1d   : > { %4300 = vmatmul.mubr.msk.bf16.gmra.mrb[4].mxu0 %vm499_vm0, %v415_v16  ;;  %v361_v55 = vld [vmem:[%s4878_s14 + $0x268] sm:$0xff]  ;;  %v422_v58 = vpack.c.bf16 %v305_v53, %v304_v50  ;;  %v307_v61 = vld [vmem:[%s4878_s14 + $0xb8] sm:$0xff]  ;;  %v308_v62 = vld [vmem:[%s4878_s14 + $0xc0] sm:$0xff] }
  0x1e   : > { %4303 = vmatprep.mubr.msk.bf16.mxu0 %vm499_vm0, %v416_v17  ;;  %v450_v59 = vpack.c.bf16 %v361_v55, %v360_v54  ;;  %v362_v63 = vld [vmem:[%s4878_s14 + $0x270] sm:$0xff]  ;;  %v363_v0 = vld [vmem:[%s4878_s14 + $0x278] sm:$0xff]  ;;  %v309_v1 = vld [vmem:[%s4878_s14 + $0xc8] sm:$0xff]  ;;  %v423_v4 = vpack.c.bf16 %v307_v61, %v306_v60 }
  0x1f   : > { %4426 = vmatpush3.bf16.msra.mxu1 %v4798_v31  ;;  %v364_v2 = vld [vmem:[%s4878_s14 + $0x280] sm:$0xff]  ;;  %v365_v3 = vld [vmem:[%s4878_s14 + $0x288] sm:$0xff]  ;;  %v451_v5 = vpack.c.bf16 %v363_v0, %v362_v63  ;;  %v424_v6 = vpack.c.bf16 %v309_v1, %v308_v62  ;;  %v310_v8 = vld [vmem:[%s4878_s14 + $0xd0] sm:$0xff] }
  0x20   : > { %4427 = vmatprep.subr.bf16.mxu1 %v4799_v36  ;;  %v452_v7 = vpack.c.bf16 %v365_v3, %v364_v2  ;;  %v311_v9 = vld [vmem:[%s4878_s14 + $0xd8] sm:$0xff]  ;;  %v312_v10 = vld [vmem:[%s4878_s14 + $0xe0] sm:$0xff]  ;;  %v366_v11 = vld [vmem:[%s4878_s14 + $0x290] sm:$0xff] }
  0x21   : > { %v367_v12 = vld [vmem:[%s4878_s14 + $0x298] sm:$0xff]  ;;  %v313_v13 = vld [vmem:[%s4878_s14 + $0xe8] sm:$0xff]  ;;  %v368_v14 = vld [vmem:[%s4878_s14 + $0x2a0] sm:$0xff]  ;;  %v425_v16 = vpack.c.bf16 %v311_v9, %v310_v8 }
  0x22   : > { %4364 = vmatmul.mubr.msk.bf16.gmra.mrb[4].mxu1 %vm499_vm0, %v447_v44  ;;  %v369_v15 = vld [vmem:[%s4878_s14 + $0x2a8] sm:$0xff]  ;;  %v453_v17 = vpack.c.bf16 %v367_v12, %v366_v11  ;;  %v426_v18 = vpack.c.bf16 %v313_v13, %v312_v10  ;;  %v314_v20 = vld [vmem:[%s4878_s14 + $0xf0] sm:$0xff]  ;;  %v315_v21 = vld [vmem:[%s4878_s14 + $0xf8] sm:$0xff] }
  0x23   : > { %4367 = vmatprep.mubr.msk.bf16.mxu1 %vm499_vm0, %v448_v46  ;;  %4428 = vmatpush3.bf16.msra.mxu1 %v4799_v36  ;;  %v454_v19 = vpack.c.bf16 %v369_v15, %v368_v14  ;;  %v370_v23 = vld [vmem:[%s4878_s14 + $0x2b0] sm:$0xff]  ;;  %v371_v24 = vld [vmem:[%s4878_s14 + $0x2b8] sm:$0xff]  ;;  %v317_v25 = vld [vmem:[%s4878_s14 + $0x108] sm:$0xff]  ;;  %v427_v28 = vpack.c.bf16 %v315_v21, %v314_v20 }
  0x24   : > { %4429 = vmatprep.subr.bf16.mxu1 %v4800_v47  ;;  %v373_v27 = vld [vmem:[%s4878_s14 + $0x2c8] sm:$0xff]  ;;  %v455_v29 = vpack.c.bf16 %v371_v24, %v370_v23  ;;  %v318_v32 = vld [vmem:[%s4878_s14 + $0x110] sm:$0xff]  ;;  %v319_v33 = vld [vmem:[%s4878_s14 + $0x118] sm:$0xff] }
  0x25   : > { %4304 = vmatmul.mubr.msk.bf16.gmra.mrb[8].mxu0 %vm499_vm0, %v417_v22  ;;  %v316_v22 = vld [vmem:[%s4878_s14 + $0x100] sm:$0xff]  ;;  %v374_v35 = vld [vmem:[%s4878_s14 + $0x2d0] sm:$0xff]  ;;  %v375_v36 = vld [vmem:[%s4878_s14 + $0x2d8] sm:$0xff]  ;;  %v429_v40 = vpack.c.bf16 %v319_v33, %v318_v32 }
  0x26   : > { %4307 = vmatprep.mubr.msk.bf16.mxu0 %vm499_vm0, %v418_v26  ;;  %v372_v26 = vld [vmem:[%s4878_s14 + $0x2c0] sm:$0xff]  ;;  %v428_v30 = vpack.c.bf16 %v317_v25, %v316_v22  ;;  %v321_v37 = vld [vmem:[%s4878_s14 + $0x128] sm:$0xff]  ;;  %v457_v41 = vpack.c.bf16 %v375_v36, %v374_v35  ;;  %v322_v44 = vld [vmem:[%s4878_s14 + $0x130] sm:$0xff] }
  0x27   : > { %4430 = vmatpush3.bf16.msra.mxu1 %v4800_v47  ;;  %v456_v31 = vpack.c.bf16 %v373_v27, %v372_v26  ;;  %v320_v34 = vld [vmem:[%s4878_s14 + $0x120] sm:$0xff]  ;;  %v377_v39 = vld [vmem:[%s4878_s14 + $0x2e8] sm:$0xff]  ;;  %v378_v47 = vld [vmem:[%s4878_s14 + $0x2f0] sm:$0xff] }
  0x28   : > { %v376_v38 = vld [vmem:[%s4878_s14 + $0x2e0] sm:$0xff]  ;;  %v430_v42 = vpack.c.bf16 %v321_v37, %v320_v34  ;;  %v379_v48 = vld [vmem:[%s4878_s14 + $0x2f8] sm:$0xff]  ;;  %v325_v49 = vld [vmem:[%s4878_s14 + $0x148] sm:$0xff] }
  0x29   : > { %v324_v46 = vld [vmem:[%s4878_s14 + $0x140] sm:$0xff]  ;;  %v381_v51 = vld [vmem:[%s4878_s14 + $0x308] sm:$0xff]  ;;  %v459_v53 = vpack.c.bf16 %v379_v48, %v378_v47  ;;  %v383_v60 = vld [vmem:[%s4878_s14 + $0x318] sm:$0xff] }
  0x2a   : > { %4368 = vmatmul.mubr.msk.bf16.gmra.mrb[8].mxu1 %vm499_vm0, %v449_v57  ;;  %v380_v50 = vld [vmem:[%s4878_s14 + $0x300] sm:$0xff]  ;;  %v432_v54 = vpack.c.bf16 %v325_v49, %v324_v46  ;;  %v327_v57 = vld [vmem:[%s4878_s14 + $0x158] sm:$0xff]  ;;  %v329_v61 = vld [vmem:[%s4878_s14 + $0x168] sm:$0xff] }
  0x2b   : > { %4371 = vmatprep.mubr.msk.bf16.mxu1 %vm499_vm0, %v450_v59  ;;  %v460_v55 = vpack.c.bf16 %v381_v51, %v380_v50  ;;  %v382_v59 = vld [vmem:[%s4878_s14 + $0x310] sm:$0xff]  ;;  %v384_v62 = vld [vmem:[%s4878_s14 + $0x320] sm:$0xff]  ;;  %v385_v63 = vld [vmem:[%s4878_s14 + $0x328] sm:$0xff] }
  0x2c   : > { %v461_v1 = vpack.c.bf16 %v383_v60, %v382_v59  ;;  %v462_v3 = vpack.c.bf16 %v385_v63, %v384_v62  ;;  %v387_v8 = vld [vmem:[%s4878_s14 + $0x338] sm:$0xff]  ;;  %v333_v9 = vld [vmem:[%s4878_s14 + $0x188] sm:$0xff]  ;;  %v388_v10 = vld [vmem:[%s4878_s14 + $0x340] sm:$0xff] }
  0x2d   : > { %4308 = vmatmul.mubr.msk.bf16.gmra.mrb[12].mxu0 %vm499_vm0, %v419_v43  ;;  %v458_v43 = vpack.c.bf16 %v377_v39, %v376_v38  ;;  %v389_v11 = vld [vmem:[%s4878_s14 + $0x348] sm:$0xff]  ;;  %v391_v20 = vld [vmem:[%s4878_s14 + $0x358] sm:$0xff]  ;;  %v392_v22 = vld [vmem:[%s4878_s14 + $0x360] sm:$0xff] }
  0x2e   : > { %4311 = vmatprep.mubr.msk.bf16.mxu0 %vm499_vm0, %v420_v45  ;;  %v323_v45 = vld [vmem:[%s4878_s14 + $0x138] sm:$0xff]  ;;  %v464_v15 = vpack.c.bf16 %v389_v11, %v388_v10  ;;  %v337_v21 = vld [vmem:[%s4878_s14 + $0x1a8] sm:$0xff]  ;;  %v396_v34 = vld [vmem:[%s4878_s14 + $0x380] sm:$0xff] }
  0x2f   : > { %v431_v52 = vpack.c.bf16 %v323_v45, %v322_v44  ;;  %v393_v23 = vld [vmem:[%s4878_s14 + $0x368] sm:$0xff]  ;;  %v395_v32 = vld [vmem:[%s4878_s14 + $0x378] sm:$0xff]  ;;  %v400_v46 = vld [vmem:[%s4878_s14 + $0x3a0] sm:$0xff] }
  0x30   : > { %v466_v27 = vpack.c.bf16 %v393_v23, %v392_v22  ;;  %v341_v33 = vld [vmem:[%s4878_s14 + $0x1c8] sm:$0xff]  ;;  %v399_v44 = vld [vmem:[%s4878_s14 + $0x398] sm:$0xff]  ;;  %v408_v63 = vld [vmem:[%s4878_s14 + $0x3e0] sm:$0xff] }
  0x31   : > { %v397_v35 = vld [vmem:[%s4878_s14 + $0x388] sm:$0xff]  ;;  %v407_v62 = vld [vmem:[%s4878_s14 + $0x3d8] sm:$0xff] }
  0x32   : > { %4372 = vmatmul.mubr.msk.bf16.gmra.mrb[12].mxu1 %vm499_vm0, %v451_v5  ;;  %v331_v5 = vld [vmem:[%s4878_s14 + $0x178] sm:$0xff]  ;;  %v468_v39 = vpack.c.bf16 %v397_v35, %v396_v34  ;;  %v345_v45 = vld [vmem:[%s4878_s14 + $0x1e8] sm:$0xff] }
  0x33   : > { %4375 = vmatprep.mubr.msk.bf16.mxu1 %vm499_vm0, %v452_v7  ;;  %v386_v7 = vld [vmem:[%s4878_s14 + $0x330] sm:$0xff]  ;;  %v401_v47 = vld [vmem:[%s4878_s14 + $0x3a8] sm:$0xff] }
  0x34   : > { %v463_v13 = vpack.c.bf16 %v387_v8, %v386_v7  ;;  %v470_v51 = vpack.c.bf16 %v401_v47, %v400_v46  ;;  %v2335_v7 = vld [vmem:[%s6054_s5 + $0x8] sm:$0xff] }
  0x35   : > { %4312 = vmatmul.mubr.msk.bf16.gmra.mrb[16].mxu0 %vm499_vm0, %v421_v56  ;;  %v326_v56 = vld [vmem:[%s4878_s14 + $0x150] sm:$0xff] }
  0x36   : > { %4315 = vmatprep.mubr.msk.bf16.mxu0 %vm499_vm0, %v422_v58  ;;  %v328_v58 = vld [vmem:[%s4878_s14 + $0x160] sm:$0xff]  ;;  %v433_v0 = vpack.c.bf16 %v327_v57, %v326_v56  ;;  %v405_v57 = vld [vmem:[%s4878_s14 + $0x3c8] sm:$0xff] }
  0x37   : > { %v434_v2 = vpack.c.bf16 %v329_v61, %v328_v58  ;;  %v404_v56 = vld [vmem:[%s4878_s14 + $0x3c0] sm:$0xff]  ;;  %v406_v61 = vld [vmem:[%s4878_s14 + $0x3d0] sm:$0xff] }
  0x38   : > { %v472_v60 = vpack.c.bf16 %v405_v57, %v404_v56 }
  0x3a   : > { %4376 = vmatmul.mubr.msk.bf16.gmra.mrb[16].mxu1 %vm499_vm0, %v453_v17  ;;  %v335_v17 = vld [vmem:[%s4878_s14 + $0x198] sm:$0xff] }
  0x3b   : > { %4379 = vmatprep.mubr.msk.bf16.mxu1 %vm499_vm0, %v454_v19  ;;  %v390_v19 = vld [vmem:[%s4878_s14 + $0x350] sm:$0xff] }
  0x3c   : > { %v465_v25 = vpack.c.bf16 %v391_v20, %v390_v19  ;;  %v2337_v19 = vld [vmem:[%s6054_s5 + $0x18] sm:$0xff] }
  0x3d   : > { %4316 = vmatmul.mubr.msk.bf16.gmra.mrb[20].mxu0 %vm499_vm0, %v423_v4  ;;  %v330_v4 = vld [vmem:[%s4878_s14 + $0x170] sm:$0xff] }
  0x3e   : > { %4319 = vmatprep.mubr.msk.bf16.mxu0 %vm499_vm0, %v424_v6  ;;  %v332_v6 = vld [vmem:[%s4878_s14 + $0x180] sm:$0xff]  ;;  %v435_v12 = vpack.c.bf16 %v331_v5, %v330_v4  ;;  %v411_v4 = vld [vmem:[%s4878_s14 + $0x3f8] sm:$0xff] }
  0x3f   : > { %v436_v14 = vpack.c.bf16 %v333_v9, %v332_v6  ;;  %v2334_v6 = vld [vmem:[%s6054_s5] sm:$0xff] }
  0x40   : > { %v4767_v8 = vpack.c.bf16 %v2335_v7, %v2334_v6  ;;  %v5090_v9 = vld [vmem:[%s6051_s2] ss:$0 sm:$0xff] }
  0x42   : > { %4380 = vmatmul.mubr.msk.bf16.gmra.mrb[20].mxu1 %vm499_vm0, %v455_v29  ;;  %v339_v29 = vld [vmem:[%s4878_s14 + $0x1b8] sm:$0xff]  ;;  %4768 = vmatprep.subr.bf16.mxu0 %v4767_v8 }
  0x43   : > { %4383 = vmatprep.mubr.msk.bf16.mxu1 %vm499_vm0, %v456_v31  ;;  %v394_v31 = vld [vmem:[%s4878_s14 + $0x370] sm:$0xff]  ;;  %4770 = vmatpush3.bf16.msra.mxu0 %v4767_v8 }
  0x44   : > { %v467_v37 = vpack.c.bf16 %v395_v32, %v394_v31 }
  0x45   : > { %4320 = vmatmul.mubr.msk.bf16.gmra.mrb[24].mxu0 %vm499_vm0, %v425_v16  ;;  %v334_v16 = vld [vmem:[%s4878_s14 + $0x190] sm:$0xff] }
  0x46   : > { %4323 = vmatprep.mubr.msk.bf16.mxu0 %vm499_vm0, %v426_v18  ;;  %v336_v18 = vld [vmem:[%s4878_s14 + $0x1a0] sm:$0xff]  ;;  %v437_v24 = vpack.c.bf16 %v335_v17, %v334_v16 }
  0x47   : > { %v438_v26 = vpack.c.bf16 %v337_v21, %v336_v18  ;;  %v2336_v18 = vld [vmem:[%s6054_s5 + $0x10] sm:$0xff] }
  0x48   : > { %v4771_v22 = vpack.c.bf16 %v2337_v19, %v2336_v18 }
  0x4a   : > { %4384 = vmatmul.mubr.msk.bf16.gmra.mrb[24].mxu1 %vm499_vm0, %v457_v41  ;;  %v343_v41 = vld [vmem:[%s4878_s14 + $0x1d8] sm:$0xff]  ;;  %4772 = vmatprep.subr.bf16.mxu0 %v4771_v22 }
  0x4b   : > { %4387 = vmatprep.mubr.msk.bf16.mxu1 %vm499_vm0, %v458_v43  ;;  %v398_v43 = vld [vmem:[%s4878_s14 + $0x390] sm:$0xff]  ;;  %4774 = vmatpush3.bf16.msra.mxu0 %v4771_v22 }
  0x4c   : > { %v469_v49 = vpack.c.bf16 %v399_v44, %v398_v43 }
  0x4d   : > { %4324 = vmatmul.mubr.msk.bf16.gmra.mrb[28].mxu0 %vm499_vm0, %v427_v28  ;;  %v338_v28 = vld [vmem:[%s4878_s14 + $0x1b0] sm:$0xff] }
  0x4e   : > { %4327 = vmatprep.mubr.msk.bf16.mxu0 %vm499_vm0, %v428_v30  ;;  %v340_v30 = vld [vmem:[%s4878_s14 + $0x1c0] sm:$0xff]  ;;  %v439_v36 = vpack.c.bf16 %v339_v29, %v338_v28 }
  0x4f   : > { %v440_v38 = vpack.c.bf16 %v341_v33, %v340_v30 }
  0x52   : > { %4388 = vmatmul.mubr.msk.bf16.gmra.mrb[28].mxu1 %vm499_vm0, %v459_v53  ;;  %v347_v53 = vld [vmem:[%s4878_s14 + $0x1f8] sm:$0xff] }
  0x53   : > { %4391 = vmatprep.mubr.msk.bf16.mxu1 %vm499_vm0, %v460_v55  ;;  %v403_v55 = vld [vmem:[%s4878_s14 + $0x3b8] sm:$0xff] }
  0x55   : > { %4328 = vmatmul.mubr.msk.bf16.gmra.mrb[32].mxu0 %vm499_vm0, %v429_v40  ;;  %v342_v40 = vld [vmem:[%s4878_s14 + $0x1d0] sm:$0xff] }
  0x56   : > { %4331 = vmatprep.mubr.msk.bf16.mxu0 %vm499_vm0, %v430_v42  ;;  %v344_v42 = vld [vmem:[%s4878_s14 + $0x1e0] sm:$0xff]  ;;  %v441_v48 = vpack.c.bf16 %v343_v41, %v342_v40 }
  0x57   : > { %v442_v50 = vpack.c.bf16 %v345_v45, %v344_v42 }
  0x5a   : > { %4392 = vmatmul.mubr.msk.bf16.gmra.mrb[32].mxu1 %vm499_vm0, %v461_v1  ;;  %v473_v1 = vpack.c.bf16 %v407_v62, %v406_v61 }
  0x5b   : > { %4395 = vmatprep.mubr.msk.bf16.mxu1 %vm499_vm0, %v462_v3  ;;  %v410_v3 = vld [vmem:[%s4878_s14 + $0x3f0] sm:$0xff] }
  0x5c   : > { %v475_v5 = vpack.c.bf16 %v411_v4, %v410_v3 }
  0x5d   : > { %4332 = vmatmul.mubr.msk.bf16.gmra.mrb[36].mxu0 %vm499_vm0, %v431_v52  ;;  %v346_v52 = vld [vmem:[%s4878_s14 + $0x1f0] sm:$0xff] }
  0x5e   : > { %4335 = vmatprep.mubr.msk.bf16.mxu0 %vm499_vm0, %v432_v54  ;;  %v402_v54 = vld [vmem:[%s4878_s14 + $0x3b0] sm:$0xff]  ;;  %v443_v58 = vpack.c.bf16 %v347_v53, %v346_v52 }
  0x5f   : > { %v471_v59 = vpack.c.bf16 %v403_v55, %v402_v54 }
  0x62   : > { %4396 = vmatmul.mubr.msk.bf16.gmra.mrb[36].mxu1 %vm499_vm0, %v463_v13 }
  0x63   : > { %4399 = vmatprep.mubr.msk.bf16.mxu1 %vm499_vm0, %v464_v15 }
  0x65   : > { %4336 = vmatmul.mubr.msk.bf16.gmra.mrb[40].mxu0 %vm499_vm0, %v433_v0  ;;  %v409_v0 = vld [vmem:[%s4878_s14 + $0x3e8] sm:$0xff] }
  0x66   : > { %4339 = vmatprep.mubr.msk.bf16.mxu0 %vm499_vm0, %v434_v2  ;;  %v474_v2 = vpack.c.bf16 %v409_v0, %v408_v63 }
  0x6a   : > { %4400 = vmatmul.mubr.msk.bf16.gmra.mrb[40].mxu1 %vm499_vm0, %v465_v25 }
  0x6b   : > { %4403 = vmatprep.mubr.msk.bf16.mxu1 %vm499_vm0, %v466_v27 }
  0x6d   : > { %4340 = vmatmul.mubr.msk.bf16.gmra.mrb[44].mxu0 %vm499_vm0, %v435_v12 }
  0x6e   : > { %4343 = vmatprep.mubr.msk.bf16.mxu0 %vm499_vm0, %v436_v14 }
  0x72   : > { %4404 = vmatmul.mubr.msk.bf16.gmra.mrb[44].mxu1 %vm499_vm0, %v467_v37 }
  0x73   : > { %4407 = vmatprep.mubr.msk.bf16.mxu1 %vm499_vm0, %v468_v39 }
  0x75   : > { %4344 = vmatmul.mubr.msk.bf16.gmra.mrb[48].mxu0 %vm499_vm0, %v437_v24 }
  0x76   : > { %4347 = vmatprep.mubr.msk.bf16.mxu0 %vm499_vm0, %v438_v26 }
  0x7a   : > { %4408 = vmatmul.mubr.msk.bf16.gmra.mrb[48].mxu1 %vm499_vm0, %v469_v49 }
  0x7b   : > { %4411 = vmatprep.mubr.msk.bf16.mxu1 %vm499_vm0, %v470_v51 }
  0x7d   : > { %4348 = vmatmul.mubr.msk.bf16.gmra.mrb[52].mxu0 %vm499_vm0, %v439_v36 }
  0x7e   : > { %4351 = vmatprep.mubr.msk.bf16.mxu0 %vm499_vm0, %v440_v38 }
  0x82   : > { %4412 = vmatmul.mubr.msk.bf16.gmra.mrb[52].mxu1 %vm499_vm0, %v471_v59 }
  0x83   : > { %4415 = vmatprep.mubr.msk.bf16.mxu1 %vm499_vm0, %v472_v60 }
  0x85   : > { %4352 = vmatmul.mubr.msk.bf16.gmra.mrb[56].mxu0 %vm499_vm0, %v441_v48 }
  0x86   : > { %4355 = vmatprep.mubr.msk.bf16.mxu0 %vm499_vm0, %v442_v50 }
  0x8a   : > { %4416 = vmatmul.mubr.msk.bf16.gmra.mrb[56].mxu1 %vm499_vm0, %v473_v1 }
  0x8b   : > { %4419 = vmatprep.mubr.msk.bf16.mxu1 %vm499_vm0, %v474_v2 }
  0x8d   : > { %4356 = vmatmul.mubr.msk.bf16.gmra.mrb[60].mxu0 %vm499_vm0, %v443_v58 }
  0x92   : > { %4420 = vmatmul.mubr.msk.bf16.gmra.mrb[60].mxu1 %vm499_vm0, %v475_v5 }
  0xe8   : > { %v4297_v10 = vpop.f32.mrb[0].mxu0 }
  0xe9   : > { %v735_v11 = vadd.f32 %v4297_v10, %v5090_v9  ;;  %v726_v12 = vpop.f32.mrb[1].mxu0 }
  0xea   : > { %v727_v13 = vadd.f32 %v5090_v9, %v726_v12  ;;  %v4298_v14 = vpop.f32.mrb[2].mxu0 }
  0xeb   : > { %v738_v15 = vadd.f32 %v4298_v14, %v5090_v9  ;;  %v729_v16 = vpop.f32.mrb[3].mxu0  ;;  %v1239_v20 = vmax.f32 %v735_v11, 0.0 }
  0xec   : > { %v730_v17 = vadd.f32 %v5090_v9, %v729_v16  ;;  %v1237_v23 = vmax.f32 %v727_v13, 0.0 }
  0xed   : > { %v1240_v21 = vmax.f32 %v738_v15, 0.0  ;;  %v4361_v42 = vpop.f32.mrb[0].mxu1 }
  0xee   : > { %v1238_v24 = vmax.f32 %v730_v17, 0.0  ;;  %v991_v45 = vadd.f32 %v4361_v42, %v5090_v9  ;;  %v982_v46 = vpop.f32.mrb[1].mxu1 }
  0xef   : > { %v1366_v25 = vpack.c.bf16 %v1240_v21, %v1239_v20  ;;  %v983_v49 = vadd.f32 %v5090_v9, %v982_v46  ;;  %v4362_v50 = vpop.f32.mrb[2].mxu1 }
  0xf0   : > { %v1365_v26 = vpack.c.bf16 %v1238_v24, %v1237_v23  ;;  %v4301_v27 = vpop.f32.mrb[4].mxu0  ;;  %v1303_v53 = vmax.f32 %v991_v45, 0.0  ;;  %v994_v54 = vadd.f32 %v4362_v50, %v5090_v9  ;;  %v985_v55 = vpop.f32.mrb[3].mxu1 }
  0xf1   : > { %v751_v28 = vadd.f32 %v4301_v27, %v5090_v9  ;;  %v742_v29 = vpop.f32.mrb[5].mxu0  ;;  %v1301_v57 = vmax.f32 %v983_v49, 0.0  ;;  %v986_v58 = vadd.f32 %v5090_v9, %v985_v55 }
  0xf2   : > { %v743_v30 = vadd.f32 %v5090_v9, %v742_v29  ;;  %v4302_v31 = vpop.f32.mrb[6].mxu0  ;;  %4431 = vmatprep.mubr.msk.bf16.mxu1 %vm1468_vm1, %v1365_v26  ;;  %v1304_v61 = vmax.f32 %v994_v54, 0.0 }
  0xf3   : > { %v754_v32 = vadd.f32 %v4302_v31, %v5090_v9  ;;  %v745_v33 = vpop.f32.mrb[7].mxu0  ;;  %4432 = vmatmul.mubr.msk.bf16.vlgmr.msra.gmra.mrb[64].mxu1 %vm1468_vm1, %v1366_v25  ;;  %v1243_v35 = vmax.f32 %v751_v28, 0.0  ;;  %v1302_v0 = vmax.f32 %v986_v58, 0.0 }
  0xf4   : > { %v746_v34 = vadd.f32 %v5090_v9, %v745_v33  ;;  %v1241_v37 = vmax.f32 %v743_v30, 0.0  ;;  %v5118_v2 = vpack.c.bf16 %v1304_v61, %v1303_v53  ;;  %v2339_v53 = vld [vmem:[%s6054_s5 + $0x28] sm:$0xff] }
  0xf5   : > { %v1244_v36 = vmax.f32 %v754_v32, 0.0  ;;  %v5120_v5 = vpack.c.bf16 %v1302_v0, %v1301_v57  ;;  %v4365_v6 = vpop.f32.mrb[4].mxu1 }
  0xf6   : > { %v1242_v38 = vmax.f32 %v746_v34, 0.0  ;;  %v1007_v10 = vadd.f32 %v4365_v6, %v5090_v9  ;;  %v998_v11 = vpop.f32.mrb[5].mxu1 }
  0xf7   : > { %v1368_v39 = vpack.c.bf16 %v1244_v36, %v1243_v35  ;;  %v999_v14 = vadd.f32 %v5090_v9, %v998_v11  ;;  %v4366_v15 = vpop.f32.mrb[6].mxu1 }
  0xf8   : > { %v1367_v40 = vpack.c.bf16 %v1242_v38, %v1241_v37  ;;  %v4305_v41 = vpop.f32.mrb[8].mxu0  ;;  %v1307_v18 = vmax.f32 %v1007_v10, 0.0  ;;  %v1010_v19 = vadd.f32 %v4366_v15, %v5090_v9  ;;  %v1001_v20 = vpop.f32.mrb[7].mxu1 }
  0xf9   : > { %v767_v43 = vadd.f32 %v4305_v41, %v5090_v9  ;;  %v758_v44 = vpop.f32.mrb[9].mxu0  ;;  %v1305_v22 = vmax.f32 %v999_v14, 0.0  ;;  %v1002_v23 = vadd.f32 %v5090_v9, %v1001_v20 }
  0xfa   : > { %v759_v47 = vadd.f32 %v5090_v9, %v758_v44  ;;  %v4306_v48 = vpop.f32.mrb[10].mxu0  ;;  %4435 = vmatprep.mubr.msk.bf16.mxu1 %vm1468_vm1, %v1367_v40  ;;  %v1308_v26 = vmax.f32 %v1010_v19, 0.0 }
  0xfb   : > { %v770_v51 = vadd.f32 %v4306_v48, %v5090_v9  ;;  %v761_v52 = vpop.f32.mrb[11].mxu0  ;;  %4436 = vmatmul.mubr.msk.bf16.gmra.mrb[68].mxu1 %vm1468_vm1, %v1368_v39  ;;  %v1247_v59 = vmax.f32 %v767_v43, 0.0  ;;  %v1306_v29 = vmax.f32 %v1002_v23, 0.0 }
  0xfc   : > { %v762_v56 = vadd.f32 %v5090_v9, %v761_v52  ;;  %v1245_v62 = vmax.f32 %v759_v47, 0.0  ;;  %v5132_v31 = vpack.c.bf16 %v1308_v26, %v1307_v18  ;;  %v2338_v52 = vld [vmem:[%s6054_s5 + $0x20] sm:$0xff] }
  0xfd   : > { %v1248_v60 = vmax.f32 %v770_v51, 0.0  ;;  %v5134_v34 = vpack.c.bf16 %v1306_v29, %v1305_v22  ;;  %v4369_v35 = vpop.f32.mrb[8].mxu1  ;;  %v4775_v57 = vpack.c.bf16 %v2339_v53, %v2338_v52 }
  0xfe   : > { %v1246_v63 = vmax.f32 %v762_v56, 0.0  ;;  %v1023_v38 = vadd.f32 %v4369_v35, %v5090_v9  ;;  %v1014_v39 = vpop.f32.mrb[9].mxu1 }
  0xff   : > { %v1370_v1 = vpack.c.bf16 %v1248_v60, %v1247_v59  ;;  %v1015_v42 = vadd.f32 %v5090_v9, %v1014_v39  ;;  %v4370_v43 = vpop.f32.mrb[10].mxu1  ;;  %4776 = vmatprep.subr.bf16.mxu0 %v4775_v57 }
 0x100   : > { %v1369_v3 = vpack.c.bf16 %v1246_v63, %v1245_v62  ;;  %v4309_v4 = vpop.f32.mrb[12].mxu0  ;;  %v1311_v46 = vmax.f32 %v1023_v38, 0.0  ;;  %v1026_v47 = vadd.f32 %v4370_v43, %v5090_v9  ;;  %v1017_v48 = vpop.f32.mrb[11].mxu1  ;;  %4778 = vmatpush3.bf16.msra.mxu0 %v4775_v57 }
 0x101   : > { %v783_v7 = vadd.f32 %v4309_v4, %v5090_v9  ;;  %v774_v8 = vpop.f32.mrb[13].mxu0  ;;  %v1309_v50 = vmax.f32 %v1015_v42, 0.0  ;;  %v1018_v51 = vadd.f32 %v5090_v9, %v1017_v48 }
 0x102   : > { %v775_v12 = vadd.f32 %v5090_v9, %v774_v8  ;;  %v4310_v13 = vpop.f32.mrb[14].mxu0  ;;  %4439 = vmatprep.mubr.msk.bf16.mxu1 %vm1468_vm1, %v1369_v3  ;;  %v1312_v56 = vmax.f32 %v1026_v47, 0.0 }
 0x103   : > { %v786_v16 = vadd.f32 %v4310_v13, %v5090_v9  ;;  %v777_v17 = vpop.f32.mrb[15].mxu0  ;;  %4440 = vmatmul.mubr.msk.bf16.gmra.mrb[72].mxu1 %vm1468_vm1, %v1370_v1  ;;  %v1251_v24 = vmax.f32 %v783_v7, 0.0  ;;  %v1310_v60 = vmax.f32 %v1018_v51, 0.0 }
 0x104   : > { %v778_v21 = vadd.f32 %v5090_v9, %v777_v17  ;;  %v1249_v27 = vmax.f32 %v775_v12, 0.0  ;;  %v5152_v62 = vpack.c.bf16 %v1312_v56, %v1311_v46 }
 0x105   : > { %v1252_v25 = vmax.f32 %v786_v16, 0.0  ;;  %v5154_v1 = vpack.c.bf16 %v1310_v60, %v1309_v50  ;;  %v4373_v3 = vpop.f32.mrb[12].mxu1 }
 0x106   : > { %v1250_v28 = vmax.f32 %v778_v21, 0.0  ;;  %v1039_v7 = vadd.f32 %v4373_v3, %v5090_v9  ;;  %v1030_v8 = vpop.f32.mrb[13].mxu1 }
 0x107   : > { %v1372_v30 = vpack.c.bf16 %v1252_v25, %v1251_v24  ;;  %v1031_v12 = vadd.f32 %v5090_v9, %v1030_v8  ;;  %v4374_v13 = vpop.f32.mrb[14].mxu1 }
 0x108   : > { %v1371_v32 = vpack.c.bf16 %v1250_v28, %v1249_v27  ;;  %v4313_v33 = vpop.f32.mrb[16].mxu0  ;;  %v1315_v16 = vmax.f32 %v1039_v7, 0.0  ;;  %v1042_v17 = vadd.f32 %v4374_v13, %v5090_v9  ;;  %v1033_v18 = vpop.f32.mrb[15].mxu1 }
 0x109   : > { %v799_v36 = vadd.f32 %v4313_v33, %v5090_v9  ;;  %v790_v37 = vpop.f32.mrb[17].mxu0  ;;  %v1313_v20 = vmax.f32 %v1031_v12, 0.0  ;;  %v1034_v21 = vadd.f32 %v5090_v9, %v1033_v18 }
 0x10a   : > { %v791_v40 = vadd.f32 %v5090_v9, %v790_v37  ;;  %v4314_v41 = vpop.f32.mrb[18].mxu0  ;;  %4443 = vmatprep.mubr.msk.bf16.mxu1 %vm1468_vm1, %v1371_v32  ;;  %v1316_v24 = vmax.f32 %v1042_v17, 0.0 }
 0x10b   : > { %v802_v44 = vadd.f32 %v4314_v41, %v5090_v9  ;;  %v793_v45 = vpop.f32.mrb[19].mxu0  ;;  %4444 = vmatmul.mubr.msk.bf16.gmra.mrb[76].mxu1 %vm1468_vm1, %v1372_v30  ;;  %v1255_v54 = vmax.f32 %v799_v36, 0.0  ;;  %v1314_v27 = vmax.f32 %v1034_v21, 0.0 }
 0x10c   : > { %v794_v49 = vadd.f32 %v5090_v9, %v793_v45  ;;  %v1253_v58 = vmax.f32 %v791_v40, 0.0  ;;  %v5166_v29 = vpack.c.bf16 %v1316_v24, %v1315_v16 }
 0x10d   : > { %v1256_v55 = vmax.f32 %v802_v44, 0.0  ;;  %v5168_v33 = vpack.c.bf16 %v1314_v27, %v1313_v20  ;;  %v4377_v35 = vpop.f32.mrb[16].mxu1 }
 0x10e   : > { %v1254_v59 = vmax.f32 %v794_v49, 0.0  ;;  %v1055_v38 = vadd.f32 %v4377_v35, %v5090_v9  ;;  %v1046_v39 = vpop.f32.mrb[17].mxu1 }
 0x10f   : > { %v1374_v61 = vpack.c.bf16 %v1256_v55, %v1255_v54  ;;  %v1047_v42 = vadd.f32 %v5090_v9, %v1046_v39  ;;  %v4378_v43 = vpop.f32.mrb[18].mxu1 }
 0x110   : > { %v1373_v63 = vpack.c.bf16 %v1254_v59, %v1253_v58  ;;  %v4317_v0 = vpop.f32.mrb[20].mxu0  ;;  %v1319_v46 = vmax.f32 %v1055_v38, 0.0  ;;  %v1058_v47 = vadd.f32 %v4378_v43, %v5090_v9  ;;  %v1049_v48 = vpop.f32.mrb[19].mxu1 }
 0x111   : > { %v815_v4 = vadd.f32 %v4317_v0, %v5090_v9  ;;  %v806_v6 = vpop.f32.mrb[21].mxu0  ;;  %v1317_v50 = vmax.f32 %v1047_v42, 0.0  ;;  %v1050_v51 = vadd.f32 %v5090_v9, %v1049_v48 }
 0x112   : > { %v807_v10 = vadd.f32 %v5090_v9, %v806_v6  ;;  %v4318_v11 = vpop.f32.mrb[22].mxu0  ;;  %4447 = vmatprep.mubr.msk.bf16.mxu1 %vm1468_vm1, %v1373_v63  ;;  %v1320_v54 = vmax.f32 %v1058_v47, 0.0 }
 0x113   : > { %v818_v14 = vadd.f32 %v4318_v11, %v5090_v9  ;;  %v809_v15 = vpop.f32.mrb[23].mxu0  ;;  %4448 = vmatmul.mubr.msk.bf16.gmra.mrb[80].mxu1 %vm1468_vm1, %v1374_v61  ;;  %v1259_v22 = vmax.f32 %v815_v4, 0.0  ;;  %v1318_v57 = vmax.f32 %v1050_v51, 0.0 }
 0x114   : > { %v810_v19 = vadd.f32 %v5090_v9, %v809_v15  ;;  %v1257_v25 = vmax.f32 %v807_v10, 0.0  ;;  %v5180_v59 = vpack.c.bf16 %v1320_v54, %v1319_v46  ;;  %v2341_v54 = vld [vmem:[%s6054_s5 + $0x38] sm:$0xff] }
 0x115   : > { %v1260_v23 = vmax.f32 %v818_v14, 0.0  ;;  %v5182_v63 = vpack.c.bf16 %v1318_v57, %v1317_v50  ;;  %v4381_v0 = vpop.f32.mrb[20].mxu1 }
 0x116   : > { %v1258_v26 = vmax.f32 %v810_v19, 0.0  ;;  %v1071_v6 = vadd.f32 %v4381_v0, %v5090_v9  ;;  %v1062_v7 = vpop.f32.mrb[21].mxu1 }
 0x117   : > { %v1376_v28 = vpack.c.bf16 %v1260_v23, %v1259_v22  ;;  %v1063_v11 = vadd.f32 %v5090_v9, %v1062_v7  ;;  %v4382_v12 = vpop.f32.mrb[22].mxu1 }
 0x118   : > { %v1375_v30 = vpack.c.bf16 %v1258_v26, %v1257_v25  ;;  %v4321_v32 = vpop.f32.mrb[24].mxu0  ;;  %v1323_v15 = vmax.f32 %v1071_v6, 0.0  ;;  %v1074_v16 = vadd.f32 %v4382_v12, %v5090_v9  ;;  %v1065_v17 = vpop.f32.mrb[23].mxu1 }
 0x119   : > { %v831_v36 = vadd.f32 %v4321_v32, %v5090_v9  ;;  %v822_v37 = vpop.f32.mrb[25].mxu0  ;;  %v1321_v19 = vmax.f32 %v1063_v11, 0.0  ;;  %v1066_v20 = vadd.f32 %v5090_v9, %v1065_v17 }
 0x11a   : > { %v823_v40 = vadd.f32 %v5090_v9, %v822_v37  ;;  %v4322_v41 = vpop.f32.mrb[26].mxu0  ;;  %4451 = vmatprep.mubr.msk.bf16.mxu1 %vm1468_vm1, %v1375_v30  ;;  %v1324_v23 = vmax.f32 %v1074_v16, 0.0 }
 0x11b   : > { %v834_v44 = vadd.f32 %v4322_v41, %v5090_v9  ;;  %v825_v45 = vpop.f32.mrb[27].mxu0  ;;  %4452 = vmatmul.mubr.msk.bf16.gmra.mrb[84].mxu1 %vm1468_vm1, %v1376_v28  ;;  %v1263_v52 = vmax.f32 %v831_v36, 0.0  ;;  %v1322_v26 = vmax.f32 %v1066_v20, 0.0 }
 0x11c   : > { %v826_v49 = vadd.f32 %v5090_v9, %v825_v45  ;;  %v1261_v55 = vmax.f32 %v823_v40, 0.0  ;;  %v5194_v28 = vpack.c.bf16 %v1324_v23, %v1323_v15 }
 0x11d   : > { %v1264_v53 = vmax.f32 %v834_v44, 0.0  ;;  %v5196_v35 = vpack.c.bf16 %v1322_v26, %v1321_v19  ;;  %v4385_v36 = vpop.f32.mrb[24].mxu1 }
 0x11e   : > { %v1262_v56 = vmax.f32 %v826_v49, 0.0  ;;  %v1087_v39 = vadd.f32 %v4385_v36, %v5090_v9  ;;  %v1078_v40 = vpop.f32.mrb[25].mxu1 }
 0x11f   : > { %v1378_v58 = vpack.c.bf16 %v1264_v53, %v1263_v52  ;;  %v1079_v43 = vadd.f32 %v5090_v9, %v1078_v40  ;;  %v4386_v44 = vpop.f32.mrb[26].mxu1  ;;  %v2340_v53 = vld [vmem:[%s6054_s5 + $0x30] sm:$0xff] }
 0x120   : > { %v1377_v60 = vpack.c.bf16 %v1262_v56, %v1261_v55  ;;  %v4325_v61 = vpop.f32.mrb[28].mxu0  ;;  %v1327_v47 = vmax.f32 %v1087_v39, 0.0  ;;  %v1090_v48 = vadd.f32 %v4386_v44, %v5090_v9  ;;  %v1081_v49 = vpop.f32.mrb[27].mxu1 }
 0x121   : > { %v847_v3 = vadd.f32 %v4325_v61, %v5090_v9  ;;  %v838_v4 = vpop.f32.mrb[29].mxu0  ;;  %v1325_v51 = vmax.f32 %v1079_v43, 0.0  ;;  %v1082_v52 = vadd.f32 %v5090_v9, %v1081_v49 }
 0x122   : > { %v839_v8 = vadd.f32 %v5090_v9, %v838_v4  ;;  %v4326_v10 = vpop.f32.mrb[30].mxu0  ;;  %4455 = vmatprep.mubr.msk.bf16.mxu1 %vm1468_vm1, %v1377_v60  ;;  %v1328_v57 = vmax.f32 %v1090_v48, 0.0 }
 0x123   : > { %v850_v13 = vadd.f32 %v4326_v10, %v5090_v9  ;;  %v841_v14 = vpop.f32.mrb[31].mxu0  ;;  %4456 = vmatmul.mubr.msk.bf16.gmra.mrb[88].mxu1 %vm1468_vm1, %v1378_v58  ;;  %v1267_v21 = vmax.f32 %v847_v3, 0.0  ;;  %v4779_v58 = vpack.c.bf16 %v2341_v54, %v2340_v53  ;;  %v1326_v0 = vmax.f32 %v1082_v52, 0.0 }
 0x124   : > { %v842_v18 = vadd.f32 %v5090_v9, %v841_v14  ;;  %v1265_v24 = vmax.f32 %v839_v8, 0.0  ;;  %v5214_v4 = vpack.c.bf16 %v1328_v57, %v1327_v47 }
 0x125   : > { %v1268_v22 = vmax.f32 %v850_v13, 0.0  ;;  %4780 = vmatprep.subr.bf16.mxu0 %v4779_v58  ;;  %v5216_v8 = vpack.c.bf16 %v1326_v0, %v1325_v51  ;;  %v4389_v10 = vpop.f32.mrb[28].mxu1 }
 0x126   : > { %v1266_v25 = vmax.f32 %v842_v18, 0.0  ;;  %4782 = vmatpush3.bf16.msra.mxu0 %v4779_v58  ;;  %v1103_v13 = vadd.f32 %v4389_v10, %v5090_v9  ;;  %v1094_v14 = vpop.f32.mrb[29].mxu1 }
 0x127   : > { %v1380_v27 = vpack.c.bf16 %v1268_v22, %v1267_v21  ;;  %v1095_v17 = vadd.f32 %v5090_v9, %v1094_v14  ;;  %v4390_v18 = vpop.f32.mrb[30].mxu1 }
 0x128   : > { %v1379_v30 = vpack.c.bf16 %v1266_v25, %v1265_v24  ;;  %v4329_v32 = vpop.f32.mrb[32].mxu0  ;;  %v1331_v21 = vmax.f32 %v1103_v13, 0.0  ;;  %v1106_v22 = vadd.f32 %v4390_v18, %v5090_v9  ;;  %v1097_v23 = vpop.f32.mrb[31].mxu1 }
 0x129   : > { %v863_v37 = vadd.f32 %v4329_v32, %v5090_v9  ;;  %v854_v38 = vpop.f32.mrb[33].mxu0  ;;  %v1329_v25 = vmax.f32 %v1095_v17, 0.0  ;;  %v1098_v26 = vadd.f32 %v5090_v9, %v1097_v23 }
 0x12a   : > { %v855_v41 = vadd.f32 %v5090_v9, %v854_v38  ;;  %v4330_v42 = vpop.f32.mrb[34].mxu0  ;;  %4459 = vmatprep.mubr.msk.bf16.mxu1 %vm1468_vm1, %v1379_v30  ;;  %v1332_v32 = vmax.f32 %v1106_v22, 0.0 }
 0x12b   : > { %v866_v45 = vadd.f32 %v4330_v42, %v5090_v9  ;;  %v857_v46 = vpop.f32.mrb[35].mxu0  ;;  %4460 = vmatmul.mubr.msk.bf16.gmra.mrb[92].mxu1 %vm1468_vm1, %v1380_v27  ;;  %v1271_v55 = vmax.f32 %v863_v37, 0.0  ;;  %v1330_v38 = vmax.f32 %v1098_v26, 0.0 }
 0x12c   : > { %v858_v50 = vadd.f32 %v5090_v9, %v857_v46  ;;  %v1269_v60 = vmax.f32 %v855_v41, 0.0  ;;  %v5228_v40 = vpack.c.bf16 %v1332_v32, %v1331_v21 }
 0x12d   : > { %v1272_v56 = vmax.f32 %v866_v45, 0.0  ;;  %v5230_v43 = vpack.c.bf16 %v1330_v38, %v1329_v25  ;;  %v4393_v44 = vpop.f32.mrb[32].mxu1 }
 0x12e   : > { %v1270_v61 = vmax.f32 %v858_v50, 0.0  ;;  %v1119_v47 = vadd.f32 %v4393_v44, %v5090_v9  ;;  %v1110_v48 = vpop.f32.mrb[33].mxu1 }
 0x12f   : > { %v1382_v3 = vpack.c.bf16 %v1272_v56, %v1271_v55  ;;  %v1111_v51 = vadd.f32 %v5090_v9, %v1110_v48  ;;  %v4394_v52 = vpop.f32.mrb[34].mxu1 }
 0x130   : > { %v1381_v6 = vpack.c.bf16 %v1270_v61, %v1269_v60  ;;  %v4333_v7 = vpop.f32.mrb[36].mxu0  ;;  %v1335_v55 = vmax.f32 %v1119_v47, 0.0  ;;  %v1122_v56 = vadd.f32 %v4394_v52, %v5090_v9  ;;  %v1113_v57 = vpop.f32.mrb[35].mxu1 }
 0x131   : > { %v879_v11 = vadd.f32 %v4333_v7, %v5090_v9  ;;  %v870_v12 = vpop.f32.mrb[37].mxu0  ;;  %v1333_v60 = vmax.f32 %v1111_v51, 0.0  ;;  %v1114_v61 = vadd.f32 %v5090_v9, %v1113_v57 }
 0x132   : > { %v871_v15 = vadd.f32 %v5090_v9, %v870_v12  ;;  %v4334_v16 = vpop.f32.mrb[38].mxu0  ;;  %4463 = vmatprep.mubr.msk.bf16.mxu1 %vm1468_vm1, %v1381_v6  ;;  %v1336_v6 = vmax.f32 %v1122_v56, 0.0 }
 0x133   : > { %v882_v19 = vadd.f32 %v4334_v16, %v5090_v9  ;;  %v873_v20 = vpop.f32.mrb[39].mxu0  ;;  %4464 = vmatmul.mubr.msk.bf16.gmra.mrb[96].mxu1 %vm1468_vm1, %v1382_v3  ;;  %v1275_v27 = vmax.f32 %v879_v11, 0.0  ;;  %v1334_v11 = vmax.f32 %v1114_v61, 0.0 }
 0x134   : > { %v874_v24 = vadd.f32 %v5090_v9, %v873_v20  ;;  %v1273_v36 = vmax.f32 %v871_v15, 0.0  ;;  %v5242_v13 = vpack.c.bf16 %v1336_v6, %v1335_v55 }
 0x135   : > { %v1276_v30 = vmax.f32 %v882_v19, 0.0  ;;  %v5244_v16 = vpack.c.bf16 %v1334_v11, %v1333_v60  ;;  %v4397_v17 = vpop.f32.mrb[36].mxu1 }
 0x136   : > { %v1274_v37 = vmax.f32 %v874_v24, 0.0  ;;  %v1135_v20 = vadd.f32 %v4397_v17, %v5090_v9  ;;  %v1126_v21 = vpop.f32.mrb[37].mxu1 }
 0x137   : > { %v1384_v39 = vpack.c.bf16 %v1276_v30, %v1275_v27  ;;  %v1127_v24 = vadd.f32 %v5090_v9, %v1126_v21  ;;  %v4398_v25 = vpop.f32.mrb[38].mxu1 }
 0x138   : > { %v1383_v41 = vpack.c.bf16 %v1274_v37, %v1273_v36  ;;  %v4337_v42 = vpop.f32.mrb[40].mxu0  ;;  %v1339_v30 = vmax.f32 %v1135_v20, 0.0  ;;  %v1138_v32 = vadd.f32 %v4398_v25, %v5090_v9  ;;  %v1129_v36 = vpop.f32.mrb[39].mxu1 }
 0x139   : > { %v895_v45 = vadd.f32 %v4337_v42, %v5090_v9  ;;  %v886_v46 = vpop.f32.mrb[41].mxu0  ;;  %v1337_v38 = vmax.f32 %v1127_v24, 0.0 }
 0x13a   : > { %v887_v49 = vadd.f32 %v5090_v9, %v886_v46  ;;  %v4338_v50 = vpop.f32.mrb[42].mxu0  ;;  %4467 = vmatprep.mubr.msk.bf16.mxu1 %vm1468_vm1, %v1383_v41  ;;  %v1340_v44 = vmax.f32 %v1138_v32, 0.0 }
 0x13b   : > { %v898_v53 = vadd.f32 %v4338_v50, %v5090_v9  ;;  %v889_v54 = vpop.f32.mrb[43].mxu0  ;;  %4468 = vmatmul.mubr.msk.bf16.gmra.mrb[100].mxu1 %vm1468_vm1, %v1384_v39  ;;  %v1279_v0 = vmax.f32 %v895_v45, 0.0  ;;  %v1130_v39 = vadd.f32 %v5090_v9, %v1129_v36 }
 0x13c   : > { %v890_v58 = vadd.f32 %v5090_v9, %v889_v54  ;;  %v1277_v7 = vmax.f32 %v887_v49, 0.0  ;;  %v5256_v49 = vpack.c.bf16 %v1340_v44, %v1339_v30 }
 0x13d   : > { %v1280_v3 = vmax.f32 %v898_v53, 0.0  ;;  %v1338_v47 = vmax.f32 %v1130_v39, 0.0  ;;  %v4401_v53 = vpop.f32.mrb[40].mxu1 }
 0x13e   : > { %v1278_v10 = vmax.f32 %v890_v58, 0.0  ;;  %v1151_v56 = vadd.f32 %v4401_v53, %v5090_v9  ;;  %v1142_v57 = vpop.f32.mrb[41].mxu1 }
 0x13f   : > { %v1386_v12 = vpack.c.bf16 %v1280_v3, %v1279_v0  ;;  %v5258_v52 = vpack.c.bf16 %v1338_v47, %v1337_v38  ;;  %v1143_v61 = vadd.f32 %v5090_v9, %v1142_v57  ;;  %v4402_v0 = vpop.f32.mrb[42].mxu1 }
 0x140   : > { %v1385_v14 = vpack.c.bf16 %v1278_v10, %v1277_v7  ;;  %v4341_v15 = vpop.f32.mrb[44].mxu0  ;;  %v1343_v7 = vmax.f32 %v1151_v56, 0.0  ;;  %v1154_v10 = vadd.f32 %v4402_v0, %v5090_v9  ;;  %v1145_v11 = vpop.f32.mrb[43].mxu1 }
 0x141   : > { %v911_v18 = vadd.f32 %v4341_v15, %v5090_v9  ;;  %v902_v19 = vpop.f32.mrb[45].mxu0  ;;  %v1146_v15 = vadd.f32 %v5090_v9, %v1145_v11 }
 0x142   : > { %v903_v22 = vadd.f32 %v5090_v9, %v902_v19  ;;  %v4342_v23 = vpop.f32.mrb[46].mxu0  ;;  %4471 = vmatprep.mubr.msk.bf16.mxu1 %vm1468_vm1, %v1385_v14  ;;  %v1341_v14 = vmax.f32 %v1143_v61, 0.0  ;;  %v1344_v19 = vmax.f32 %v1154_v10, 0.0 }
 0x143   : > { %v914_v26 = vadd.f32 %v4342_v23, %v5090_v9  ;;  %v905_v27 = vpop.f32.mrb[47].mxu0  ;;  %4472 = vmatmul.mubr.msk.bf16.gmra.mrb[104].mxu1 %vm1468_vm1, %v1386_v12  ;;  %v1283_v41 = vmax.f32 %v911_v18, 0.0 }
 0x144   : > { %v906_v37 = vadd.f32 %v5090_v9, %v905_v27  ;;  %v1281_v45 = vmax.f32 %v903_v22, 0.0  ;;  %v1342_v22 = vmax.f32 %v1146_v15, 0.0  ;;  %v5270_v24 = vpack.c.bf16 %v1344_v19, %v1343_v7 }
 0x145   : > { %v1284_v42 = vmax.f32 %v914_v26, 0.0  ;;  %v4405_v30 = vpop.f32.mrb[44].mxu1 }
 0x146   : > { %v1282_v46 = vmax.f32 %v906_v37, 0.0  ;;  %v5272_v27 = vpack.c.bf16 %v1342_v22, %v1341_v14  ;;  %v1167_v37 = vadd.f32 %v4405_v30, %v5090_v9  ;;  %v1158_v38 = vpop.f32.mrb[45].mxu1 }
 0x147   : > { %v1388_v48 = vpack.c.bf16 %v1284_v42, %v1283_v41  ;;  %v1159_v42 = vadd.f32 %v5090_v9, %v1158_v38  ;;  %v4406_v44 = vpop.f32.mrb[46].mxu1 }
 0x148   : > { %v1387_v50 = vpack.c.bf16 %v1282_v46, %v1281_v45  ;;  %v4345_v51 = vpop.f32.mrb[48].mxu0  ;;  %v1347_v47 = vmax.f32 %v1167_v37, 0.0 }
 0x149   : > { %v927_v54 = vadd.f32 %v4345_v51, %v5090_v9  ;;  %v918_v55 = vpop.f32.mrb[49].mxu0  ;;  %v1345_v53 = vmax.f32 %v1159_v42, 0.0 }
 0x14a   : > { %v919_v58 = vadd.f32 %v5090_v9, %v918_v55  ;;  %v4346_v60 = vpop.f32.mrb[50].mxu0  ;;  %4475 = vmatprep.mubr.msk.bf16.mxu1 %vm1468_vm1, %v1387_v50  ;;  %v1161_v50 = vpop.f32.mrb[47].mxu1 }
 0x14b   : > { %v930_v3 = vadd.f32 %v4346_v60, %v5090_v9  ;;  %v921_v6 = vpop.f32.mrb[51].mxu0  ;;  %4476 = vmatmul.mubr.msk.bf16.gmra.mrb[108].mxu1 %vm1468_vm1, %v1388_v48  ;;  %v1287_v17 = vmax.f32 %v927_v54, 0.0  ;;  %v1170_v48 = vadd.f32 %v4406_v44, %v5090_v9  ;;  %v1162_v54 = vadd.f32 %v5090_v9, %v1161_v50 }
 0x14c   : > { %v922_v12 = vadd.f32 %v5090_v9, %v921_v6  ;;  %v1285_v20 = vmax.f32 %v919_v58, 0.0 }
 0x14d   : > { %v1288_v18 = vmax.f32 %v930_v3, 0.0  ;;  %v1348_v57 = vmax.f32 %v1170_v48, 0.0  ;;  %v1346_v61 = vmax.f32 %v1162_v54, 0.0  ;;  %v4409_v11 = vpop.f32.mrb[48].mxu1 }
 0x14e   : > { %v1286_v21 = vmax.f32 %v922_v12, 0.0  ;;  %v1183_v15 = vadd.f32 %v4409_v11, %v5090_v9 }
 0x14f   : > { %v1390_v23 = vpack.c.bf16 %v1288_v18, %v1287_v17  ;;  %v5284_v3 = vpack.c.bf16 %v1348_v57, %v1347_v47  ;;  %v5286_v10 = vpack.c.bf16 %v1346_v61, %v1345_v53  ;;  %v1174_v17 = vpop.f32.mrb[49].mxu1 }
 0x150   : > { %v1389_v25 = vpack.c.bf16 %v1286_v21, %v1285_v20  ;;  %v4349_v26 = vpop.f32.mrb[52].mxu0  ;;  %v1175_v20 = vadd.f32 %v5090_v9, %v1174_v17  ;;  %v4410_v21 = vpop.f32.mrb[50].mxu1 }
 0x151   : > { %v943_v32 = vadd.f32 %v4349_v26, %v5090_v9  ;;  %v934_v36 = vpop.f32.mrb[53].mxu0  ;;  %v1186_v26 = vadd.f32 %v4410_v21, %v5090_v9  ;;  %v1177_v30 = vpop.f32.mrb[51].mxu1 }
 0x152   : > { %v935_v39 = vadd.f32 %v5090_v9, %v934_v36  ;;  %v4350_v41 = vpop.f32.mrb[54].mxu0  ;;  %4479 = vmatprep.mubr.msk.bf16.mxu1 %vm1468_vm1, %v1389_v25  ;;  %v1351_v25 = vmax.f32 %v1183_v15, 0.0  ;;  %v1349_v36 = vmax.f32 %v1175_v20, 0.0  ;;  %v1178_v37 = vadd.f32 %v5090_v9, %v1177_v30 }
 0x153   : > { %v946_v45 = vadd.f32 %v4350_v41, %v5090_v9  ;;  %v937_v46 = vpop.f32.mrb[55].mxu0  ;;  %4480 = vmatmul.mubr.msk.bf16.gmra.mrb[112].mxu1 %vm1468_vm1, %v1390_v23  ;;  %v1291_v55 = vmax.f32 %v943_v32, 0.0  ;;  %v1352_v41 = vmax.f32 %v1186_v26, 0.0 }
 0x154   : > { %v938_v51 = vadd.f32 %v5090_v9, %v937_v46  ;;  %v1289_v58 = vmax.f32 %v935_v39, 0.0 }
 0x155   : > { %v1292_v56 = vmax.f32 %v946_v45, 0.0  ;;  %v1350_v45 = vmax.f32 %v1178_v37, 0.0  ;;  %v5298_v47 = vpack.c.bf16 %v1352_v41, %v1351_v25  ;;  %v4413_v53 = vpop.f32.mrb[52].mxu1 }
 0x156   : > { %v1290_v60 = vmax.f32 %v938_v51, 0.0  ;;  %v1190_v57 = vpop.f32.mrb[53].mxu1 }
 0x157   : > { %v1392_v0 = vpack.c.bf16 %v1292_v56, %v1291_v55  ;;  %v5300_v51 = vpack.c.bf16 %v1350_v45, %v1349_v36  ;;  %v1199_v56 = vadd.f32 %v4413_v53, %v5090_v9  ;;  %v1191_v61 = vadd.f32 %v5090_v9, %v1190_v57 }
 0x158   : > { %v1391_v6 = vpack.c.bf16 %v1290_v60, %v1289_v58  ;;  %v4353_v7 = vpop.f32.mrb[56].mxu0 }
 0x159   : > { %v959_v12 = vadd.f32 %v4353_v7, %v5090_v9  ;;  %v950_v14 = vpop.f32.mrb[57].mxu0  ;;  %v1355_v11 = vmax.f32 %v1199_v56, 0.0  ;;  %v1353_v17 = vmax.f32 %v1191_v61, 0.0 }
 0x15a   : > { %v951_v18 = vadd.f32 %v5090_v9, %v950_v14  ;;  %v4354_v19 = vpop.f32.mrb[58].mxu0  ;;  %4483 = vmatprep.mubr.msk.bf16.mxu1 %vm1468_vm1, %v1391_v6 }
 0x15b   : > { %v962_v22 = vadd.f32 %v4354_v19, %v5090_v9  ;;  %v953_v23 = vpop.f32.mrb[59].mxu0  ;;  %4484 = vmatmul.mubr.msk.bf16.gmra.mrb[116].mxu1 %vm1468_vm1, %v1392_v0  ;;  %v1295_v38 = vmax.f32 %v959_v12, 0.0  ;;  %v4414_v0 = vpop.f32.mrb[54].mxu1 }
 0x15c   : > { %v954_v32 = vadd.f32 %v5090_v9, %v953_v23  ;;  %v1293_v42 = vmax.f32 %v951_v18, 0.0  ;;  %v1202_v12 = vadd.f32 %v4414_v0, %v5090_v9  ;;  %v1193_v14 = vpop.f32.mrb[55].mxu1 }
 0x15d   : > { %v1296_v39 = vmax.f32 %v962_v22, 0.0  ;;  %v1194_v18 = vadd.f32 %v5090_v9, %v1193_v14  ;;  %v4417_v37 = vpop.f32.mrb[56].mxu1 }
 0x15e   : > { %v1294_v44 = vmax.f32 %v954_v32, 0.0  ;;  %v1356_v21 = vmax.f32 %v1202_v12, 0.0 }
 0x15f   : > { %v1394_v46 = vpack.c.bf16 %v1296_v39, %v1295_v38  ;;  %v1354_v25 = vmax.f32 %v1194_v18, 0.0  ;;  %v1215_v38 = vadd.f32 %v4417_v37, %v5090_v9  ;;  %v1206_v39 = vpop.f32.mrb[57].mxu1 }
 0x160   : > { %v1393_v48 = vpack.c.bf16 %v1294_v44, %v1293_v42  ;;  %v4357_v50 = vpop.f32.mrb[60].mxu0  ;;  %v5312_v30 = vpack.c.bf16 %v1356_v21, %v1355_v11  ;;  %v1207_v41 = vadd.f32 %v5090_v9, %v1206_v39  ;;  %v4418_v42 = vpop.f32.mrb[58].mxu1 }
 0x161   : > { %v975_v54 = vadd.f32 %v4357_v50, %v5090_v9  ;;  %v966_v55 = vpop.f32.mrb[61].mxu0  ;;  %v5314_v36 = vpack.c.bf16 %v1354_v25, %v1353_v17  ;;  %v1359_v44 = vmax.f32 %v1215_v38, 0.0  ;;  %v1218_v45 = vadd.f32 %v4418_v42, %v5090_v9 }
 0x162   : > { %v967_v58 = vadd.f32 %v5090_v9, %v966_v55  ;;  %v4358_v60 = vpop.f32.mrb[62].mxu0  ;;  %4487 = vmatprep.mubr.msk.bf16.mxu1 %vm1468_vm1, %v1393_v48  ;;  %v1357_v48 = vmax.f32 %v1207_v41, 0.0 }
 0x163   : > { %v978_v6 = vadd.f32 %v4358_v60, %v5090_v9  ;;  %v969_v7 = vpop.f32.mrb[63].mxu0  ;;  %4488 = vmatmul.mubr.msk.bf16.gmra.mrb[120].mxu1 %vm1468_vm1, %v1394_v46  ;;  %v1299_v19 = vmax.f32 %v975_v54, 0.0  ;;  %v1209_v46 = vpop.f32.mrb[59].mxu1  ;;  %v1360_v53 = vmax.f32 %v1218_v45, 0.0 }
 0x164   : > { %v970_v15 = vadd.f32 %v5090_v9, %v969_v7  ;;  %v1297_v22 = vmax.f32 %v967_v58, 0.0  ;;  %v1210_v50 = vadd.f32 %v5090_v9, %v1209_v46 }
 0x165   : > { %v1300_v20 = vmax.f32 %v978_v6, 0.0  ;;  %v5324_v55 = vpack.c.bf16 %v1360_v53, %v1359_v44  ;;  %v4421_v57 = vpop.f32.mrb[60].mxu1 }
 0x166   : > { %v1298_v23 = vmax.f32 %v970_v15, 0.0  ;;  %v1358_v54 = vmax.f32 %v1210_v50, 0.0  ;;  %v1231_v58 = vadd.f32 %v4421_v57, %v5090_v9  ;;  %v1222_v60 = vpop.f32.mrb[61].mxu1 }
 0x167   : > { %v1396_v26 = vpack.c.bf16 %v1300_v20, %v1299_v19  ;;  %v1223_v61 = vadd.f32 %v5090_v9, %v1222_v60  ;;  %v4422_v0 = vpop.f32.mrb[62].mxu1 }
 0x168   : > { %v1395_v32 = vpack.c.bf16 %v1298_v23, %v1297_v22  ;;  %v5326_v56 = vpack.c.bf16 %v1358_v54, %v1357_v48  ;;  %v1234_v6 = vadd.f32 %v4422_v0, %v5090_v9  ;;  %v1225_v7 = vpop.f32.mrb[63].mxu1 }
 0x169   : > { %v1361_v11 = vmax.f32 %v1223_v61, 0.0  ;;  %v1226_v12 = vadd.f32 %v5090_v9, %v1225_v7  ;;  %v5383_v9 = vld [vmem:[%s6053_s4] ss:$0 sm:$0xff] }
 0x16a   : > { %4491 = vmatprep.mubr.msk.bf16.mxu1 %vm1468_vm1, %v1395_v32  ;;  %v1364_v14 = vmax.f32 %v1234_v6, 0.0 }
 0x16b   : > { %4492 = vmatmul.mubr.msk.bf16.gmra.mrb[124].mxu1 %vm1468_vm1, %v1396_v26  ;;  %v1362_v15 = vmax.f32 %v1226_v12, 0.0 }
 0x16c   : > { %4495 = vmatprep.mubr.msk.bf16.mxu1 %vm1468_vm1, %v5120_v5  ;;  %v1363_v5 = vmax.f32 %v1231_v58, 0.0 }
 0x16d   : > { %v5338_v18 = vpack.c.bf16 %v1362_v15, %v1361_v11 }
 0x16e   : > { %v5336_v17 = vpack.c.bf16 %v1364_v14, %v1363_v5 }
 0x173   : > { %4496 = vmatmul.mubr.msk.bf16.gmra.mrb[128].mxu1 %vm1468_vm1, %v5118_v2 }
 0x174   : > { %4499 = vmatprep.mubr.msk.bf16.mxu1 %vm1468_vm1, %v5134_v34 }
 0x17b   : > { %4500 = vmatmul.mubr.msk.bf16.gmra.mrb[132].mxu1 %vm1468_vm1, %v5132_v31 }
 0x17c   : > { %4503 = vmatprep.mubr.msk.bf16.mxu1 %vm1468_vm1, %v5154_v1 }
 0x183   : > { %4504 = vmatmul.mubr.msk.bf16.gmra.mrb[136].mxu1 %vm1468_vm1, %v5152_v62 }
 0x184   : > { %4507 = vmatprep.mubr.msk.bf16.mxu1 %vm1468_vm1, %v5168_v33 }
 0x18b   : > { %4508 = vmatmul.mubr.msk.bf16.gmra.mrb[140].mxu1 %vm1468_vm1, %v5166_v29 }
 0x18c   : > { %4511 = vmatprep.mubr.msk.bf16.mxu1 %vm1468_vm1, %v5182_v63 }
 0x193   : > { %4512 = vmatmul.mubr.msk.bf16.gmra.mrb[144].mxu1 %vm1468_vm1, %v5180_v59 }
 0x194   : > { %4515 = vmatprep.mubr.msk.bf16.mxu1 %vm1468_vm1, %v5196_v35 }
 0x19b   : > { %4516 = vmatmul.mubr.msk.bf16.gmra.mrb[148].mxu1 %vm1468_vm1, %v5194_v28 }
 0x19c   : > { %4519 = vmatprep.mubr.msk.bf16.mxu1 %vm1468_vm1, %v5216_v8 }
 0x1a3   : > { %4520 = vmatmul.mubr.msk.bf16.gmra.mrb[152].mxu1 %vm1468_vm1, %v5214_v4 }
 0x1a4   : > { %4523 = vmatprep.mubr.msk.bf16.mxu1 %vm1468_vm1, %v5230_v43 }
 0x1ab   : > { %4524 = vmatmul.mubr.msk.bf16.gmra.mrb[156].mxu1 %vm1468_vm1, %v5228_v40 }
 0x1ac   : > { %4527 = vmatprep.mubr.msk.bf16.mxu1 %vm1468_vm1, %v5244_v16 }
 0x1b3   : > { %4528 = vmatmul.mubr.msk.bf16.gmra.mrb[160].mxu1 %vm1468_vm1, %v5242_v13 }
 0x1b4   : > { %4531 = vmatprep.mubr.msk.bf16.mxu1 %vm1468_vm1, %v5258_v52 }
 0x1bb   : > { %4532 = vmatmul.mubr.msk.bf16.gmra.mrb[164].mxu1 %vm1468_vm1, %v5256_v49 }
 0x1bc   : > { %4535 = vmatprep.mubr.msk.bf16.mxu1 %vm1468_vm1, %v5272_v27 }
 0x1c3   : > { %4536 = vmatmul.mubr.msk.bf16.gmra.mrb[168].mxu1 %vm1468_vm1, %v5270_v24 }
 0x1c4   : > { %4539 = vmatprep.mubr.msk.bf16.mxu1 %vm1468_vm1, %v5286_v10 }
 0x1c6   : > { %v4433_v2 = vpop.f32.mrb[64].mxu1 }
 0x1c7   : > { %v1695_v31 = vpop.f32.mrb[65].mxu1  ;;  %v1704_v1 = vadd.f32 %v4433_v2, %v5383_v9 }
 0x1c8   : > { %v1696_v34 = vadd.f32 %v5383_v9, %v1695_v31  ;;  %v4434_v62 = vpop.f32.mrb[66].mxu1 }
 0x1c9   : > { %v1698_v29 = vpop.f32.mrb[67].mxu1  ;;  %v1707_v63 = vadd.f32 %v4434_v62, %v5383_v9  ;;  %v2208_v35 = vmax.f32 %v1704_v1, 0.0 }
 0x1ca   : > { %v2206_v33 = vmax.f32 %v1696_v34, 0.0  ;;  %v1699_v59 = vadd.f32 %v5383_v9, %v1698_v29 }
 0x1cb   : > { %4540 = vmatmul.mubr.msk.bf16.gmra.mrb[172].mxu1 %vm1468_vm1, %v5284_v3  ;;  %v2209_v40 = vmax.f32 %v1707_v63, 0.0 }
 0x1cc   : > { %v2207_v28 = vmax.f32 %v1699_v59, 0.0  ;;  %4543 = vmatprep.mubr.msk.bf16.mxu1 %vm1468_vm1, %v5300_v51  ;;  %4575 = vmatprep.mubr.msk.f32.mxu0 %vm1468_vm1, %v2206_v33 }
 0x1ce   : > { %v4437_v4 = vpop.f32.mrb[68].mxu1  ;;  %4576 = vmatmul.mubr.msk.f32.vlgmr.msra.gmra.mrb[64].mxu0 %vm1468_vm1, %v2207_v28 }
 0x1cf   : > { %v1711_v8 = vpop.f32.mrb[69].mxu1  ;;  %4578 = vmatprep.mubr.msk.f32.mxu0 %vm1468_vm1, %v2208_v35  ;;  %v1720_v16 = vadd.f32 %v4437_v4, %v5383_v9 }
 0x1d0   : > { %v1712_v43 = vadd.f32 %v5383_v9, %v1711_v8  ;;  %v4438_v13 = vpop.f32.mrb[70].mxu1 }
 0x1d1   : > { %v1714_v49 = vpop.f32.mrb[71].mxu1  ;;  %v1723_v27 = vadd.f32 %v4438_v13, %v5383_v9  ;;  %v2212_v10 = vmax.f32 %v1720_v16, 0.0 }
 0x1d2   : > { %v2210_v52 = vmax.f32 %v1712_v43, 0.0  ;;  %v1715_v24 = vadd.f32 %v5383_v9, %v1714_v49  ;;  %4579 = vmatmul.mubr.msk.f32.gmra.mrb[66].mxu0 %vm1468_vm1, %v2209_v40 }
 0x1d3   : > { %4544 = vmatmul.mubr.msk.bf16.gmra.mrb[176].mxu1 %vm1468_vm1, %v5298_v47  ;;  %v2213_v20 = vmax.f32 %v1723_v27, 0.0 }
 0x1d4   : > { %v2211_v3 = vmax.f32 %v1715_v24, 0.0  ;;  %4547 = vmatprep.mubr.msk.bf16.mxu1 %vm1468_vm1, %v5314_v36  ;;  %4581 = vmatprep.mubr.msk.f32.mxu0 %vm1468_vm1, %v2210_v52 }
 0x1d6   : > { %v4441_v51 = vpop.f32.mrb[72].mxu1  ;;  %4582 = vmatmul.mubr.msk.f32.gmra.mrb[68].mxu0 %vm1468_vm1, %v2211_v3 }
 0x1d7   : > { %v1727_v19 = vpop.f32.mrb[73].mxu1  ;;  %4584 = vmatprep.mubr.msk.f32.mxu0 %vm1468_vm1, %v2212_v10  ;;  %v1736_v47 = vadd.f32 %v4441_v51, %v5383_v9 }
 0x1d8   : > { %v1728_v21 = vadd.f32 %v5383_v9, %v1727_v19  ;;  %v4442_v22 = vpop.f32.mrb[74].mxu1 }
 0x1d9   : > { %v1730_v23 = vpop.f32.mrb[75].mxu1  ;;  %v1739_v32 = vadd.f32 %v4442_v22, %v5383_v9  ;;  %v2216_v37 = vmax.f32 %v1736_v47, 0.0 }
 0x1da   : > { %v2214_v25 = vmax.f32 %v1728_v21, 0.0  ;;  %v1731_v26 = vadd.f32 %v5383_v9, %v1730_v23  ;;  %4585 = vmatmul.mubr.msk.f32.gmra.mrb[70].mxu0 %vm1468_vm1, %v2213_v20 }
 0x1db   : > { %4548 = vmatmul.mubr.msk.bf16.gmra.mrb[180].mxu1 %vm1468_vm1, %v5312_v30  ;;  %v2217_v41 = vmax.f32 %v1739_v32, 0.0 }
 0x1dc   : > { %v2215_v36 = vmax.f32 %v1731_v26, 0.0  ;;  %4551 = vmatprep.mubr.msk.bf16.mxu1 %vm1468_vm1, %v5326_v56  ;;  %4587 = vmatprep.mubr.msk.f32.mxu0 %vm1468_vm1, %v2214_v25 }
 0x1de   : > { %v4445_v38 = vpop.f32.mrb[76].mxu1  ;;  %4588 = vmatmul.mubr.msk.f32.gmra.mrb[72].mxu0 %vm1468_vm1, %v2215_v36 }
 0x1df   : > { %v1743_v39 = vpop.f32.mrb[77].mxu1  ;;  %4590 = vmatprep.mubr.msk.f32.mxu0 %vm1468_vm1, %v2216_v37  ;;  %v1752_v30 = vadd.f32 %v4445_v38, %v5383_v9 }
 0x1e0   : > { %v1744_v42 = vadd.f32 %v5383_v9, %v1743_v39  ;;  %v4446_v44 = vpop.f32.mrb[78].mxu1 }
 0x1e1   : > { %v1746_v45 = vpop.f32.mrb[79].mxu1  ;;  %v1755_v50 = vadd.f32 %v4446_v44, %v5383_v9  ;;  %v2220_v54 = vmax.f32 %v1752_v30, 0.0 }
 0x1e2   : > { %v2218_v46 = vmax.f32 %v1744_v42, 0.0  ;;  %v1747_v48 = vadd.f32 %v5383_v9, %v1746_v45  ;;  %4591 = vmatmul.mubr.msk.f32.gmra.mrb[74].mxu0 %vm1468_vm1, %v2217_v41 }
 0x1e3   : > { %4552 = vmatmul.mubr.msk.bf16.gmra.mrb[184].mxu1 %vm1468_vm1, %v5324_v55  ;;  %v2221_v58 = vmax.f32 %v1755_v50, 0.0 }
 0x1e4   : > { %v2219_v53 = vmax.f32 %v1747_v48, 0.0  ;;  %4555 = vmatprep.mubr.msk.bf16.mxu1 %vm1468_vm1, %v5338_v18  ;;  %4593 = vmatprep.mubr.msk.f32.mxu0 %vm1468_vm1, %v2218_v46 }
 0x1e6   : > { %v4449_v56 = vpop.f32.mrb[80].mxu1  ;;  %4594 = vmatmul.mubr.msk.f32.gmra.mrb[76].mxu0 %vm1468_vm1, %v2219_v53 }
 0x1e7   : > { %v1759_v57 = vpop.f32.mrb[81].mxu1  ;;  %4596 = vmatprep.mubr.msk.f32.mxu0 %vm1468_vm1, %v2220_v54  ;;  %v1768_v55 = vadd.f32 %v4449_v56, %v5383_v9 }
 0x1e8   : > { %v1760_v60 = vadd.f32 %v5383_v9, %v1759_v57  ;;  %v4450_v61 = vpop.f32.mrb[82].mxu1 }
 0x1e9   : > { %v1762_v0 = vpop.f32.mrb[83].mxu1  ;;  %v1771_v7 = vadd.f32 %v4450_v61, %v5383_v9  ;;  %v2224_v12 = vmax.f32 %v1768_v55, 0.0 }
 0x1ea   : > { %v2222_v5 = vmax.f32 %v1760_v60, 0.0  ;;  %v1763_v6 = vadd.f32 %v5383_v9, %v1762_v0  ;;  %4597 = vmatmul.mubr.msk.f32.gmra.mrb[78].mxu0 %vm1468_vm1, %v2221_v58 }
 0x1eb   : > { %4556 = vmatmul.mubr.msk.bf16.gmra.mrb[188].mxu1 %vm1468_vm1, %v5336_v17  ;;  %v2225_v18 = vmax.f32 %v1771_v7, 0.0 }
 0x1ec   : > { %v2223_v11 = vmax.f32 %v1763_v6, 0.0  ;;  %4599 = vmatprep.mubr.msk.f32.mxu0 %vm1468_vm1, %v2222_v5 }
 0x1ee   : > { %v4453_v14 = vpop.f32.mrb[84].mxu1  ;;  %4600 = vmatmul.mubr.msk.f32.gmra.mrb[80].mxu0 %vm1468_vm1, %v2223_v11 }
 0x1ef   : > { %v1775_v15 = vpop.f32.mrb[85].mxu1  ;;  %4602 = vmatprep.mubr.msk.f32.mxu0 %vm1468_vm1, %v2224_v12  ;;  %v1784_v34 = vadd.f32 %v4453_v14, %v5383_v9 }
 0x1f0   : > { %v1776_v2 = vadd.f32 %v5383_v9, %v1775_v15  ;;  %v4454_v31 = vpop.f32.mrb[86].mxu1 }
 0x1f1   : > { %v1778_v62 = vpop.f32.mrb[87].mxu1  ;;  %v1787_v29 = vadd.f32 %v4454_v31, %v5383_v9  ;;  %v2228_v59 = vmax.f32 %v1784_v34, 0.0 }
 0x1f2   : > { %v2226_v17 = vmax.f32 %v1776_v2, 0.0  ;;  %v1779_v1 = vadd.f32 %v5383_v9, %v1778_v62  ;;  %4603 = vmatmul.mubr.msk.f32.gmra.mrb[82].mxu0 %vm1468_vm1, %v2225_v18 }
 0x1f3   : > { %v2229_v35 = vmax.f32 %v1787_v29, 0.0 }
 0x1f4   : > { %v2227_v33 = vmax.f32 %v1779_v1, 0.0  ;;  %4605 = vmatprep.mubr.msk.f32.mxu0 %vm1468_vm1, %v2226_v17 }
 0x1f6   : > { %v4457_v63 = vpop.f32.mrb[88].mxu1  ;;  %4606 = vmatmul.mubr.msk.f32.gmra.mrb[84].mxu0 %vm1468_vm1, %v2227_v33 }
 0x1f7   : > { %v1791_v28 = vpop.f32.mrb[89].mxu1  ;;  %4608 = vmatprep.mubr.msk.f32.mxu0 %vm1468_vm1, %v2228_v59  ;;  %v1800_v40 = vadd.f32 %v4457_v63, %v5383_v9 }
 0x1f8   : > { %v1792_v4 = vadd.f32 %v5383_v9, %v1791_v28  ;;  %v4458_v8 = vpop.f32.mrb[90].mxu1 }
 0x1f9   : > { %v1794_v43 = vpop.f32.mrb[91].mxu1  ;;  %v1803_v49 = vadd.f32 %v4458_v8, %v5383_v9  ;;  %v2232_v24 = vmax.f32 %v1800_v40, 0.0 }
 0x1fa   : > { %v2230_v13 = vmax.f32 %v1792_v4, 0.0  ;;  %v1795_v16 = vadd.f32 %v5383_v9, %v1794_v43  ;;  %4609 = vmatmul.mubr.msk.f32.gmra.mrb[86].mxu0 %vm1468_vm1, %v2229_v35 }
 0x1fb   : > { %v2233_v10 = vmax.f32 %v1803_v49, 0.0 }
 0x1fc   : > { %v2231_v52 = vmax.f32 %v1795_v16, 0.0  ;;  %4611 = vmatprep.mubr.msk.f32.mxu0 %vm1468_vm1, %v2230_v13 }
 0x1fe   : > { %v4461_v27 = vpop.f32.mrb[92].mxu1  ;;  %4612 = vmatmul.mubr.msk.f32.gmra.mrb[88].mxu0 %vm1468_vm1, %v2231_v52 }
 0x1ff   : > { %v1807_v3 = vpop.f32.mrb[93].mxu1  ;;  %4614 = vmatprep.mubr.msk.f32.mxu0 %vm1468_vm1, %v2232_v24  ;;  %v1816_v20 = vadd.f32 %v4461_v27, %v5383_v9 }
 0x200   : > { %v1808_v51 = vadd.f32 %v5383_v9, %v1807_v3  ;;  %v4462_v19 = vpop.f32.mrb[94].mxu1 }
 0x201   : > { %v1810_v21 = vpop.f32.mrb[95].mxu1  ;;  %v1819_v23 = vadd.f32 %v4462_v19, %v5383_v9  ;;  %v2236_v26 = vmax.f32 %v1816_v20, 0.0 }
 0x202   : > { %v2234_v22 = vmax.f32 %v1808_v51, 0.0  ;;  %v1811_v47 = vadd.f32 %v5383_v9, %v1810_v21  ;;  %4615 = vmatmul.mubr.msk.f32.gmra.mrb[90].mxu0 %vm1468_vm1, %v2233_v10 }
 0x203   : > { %v2237_v37 = vmax.f32 %v1819_v23, 0.0 }
 0x204   : > { %v2235_v25 = vmax.f32 %v1811_v47, 0.0  ;;  %4617 = vmatprep.mubr.msk.f32.mxu0 %vm1468_vm1, %v2234_v22 }
 0x206   : > { %v4465_v32 = vpop.f32.mrb[96].mxu1  ;;  %4618 = vmatmul.mubr.msk.f32.gmra.mrb[92].mxu0 %vm1468_vm1, %v2235_v25 }
 0x207   : > { %v1823_v36 = vpop.f32.mrb[97].mxu1  ;;  %4620 = vmatprep.mubr.msk.f32.mxu0 %vm1468_vm1, %v2236_v26  ;;  %v1832_v41 = vadd.f32 %v4465_v32, %v5383_v9 }
 0x208   : > { %v1824_v38 = vadd.f32 %v5383_v9, %v1823_v36  ;;  %v4466_v39 = vpop.f32.mrb[98].mxu1 }
 0x209   : > { %v1826_v42 = vpop.f32.mrb[99].mxu1  ;;  %v1835_v45 = vadd.f32 %v4466_v39, %v5383_v9  ;;  %v2240_v48 = vmax.f32 %v1832_v41, 0.0 }
 0x20a   : > { %v2238_v44 = vmax.f32 %v1824_v38, 0.0  ;;  %v1827_v30 = vadd.f32 %v5383_v9, %v1826_v42  ;;  %4621 = vmatmul.mubr.msk.f32.gmra.mrb[94].mxu0 %vm1468_vm1, %v2237_v37 }
 0x20b   : > { %v2241_v54 = vmax.f32 %v1835_v45, 0.0 }
 0x20c   : > { %v2239_v46 = vmax.f32 %v1827_v30, 0.0  ;;  %4623 = vmatprep.mubr.msk.f32.mxu0 %vm1468_vm1, %v2238_v44 }
 0x20e   : > { %v4469_v50 = vpop.f32.mrb[100].mxu1  ;;  %4624 = vmatmul.mubr.msk.f32.gmra.mrb[96].mxu0 %vm1468_vm1, %v2239_v46 }
 0x20f   : > { %v1839_v53 = vpop.f32.mrb[101].mxu1  ;;  %4626 = vmatprep.mubr.msk.f32.mxu0 %vm1468_vm1, %v2240_v48  ;;  %v1848_v58 = vadd.f32 %v4469_v50, %v5383_v9 }
 0x210   : > { %v1840_v56 = vadd.f32 %v5383_v9, %v1839_v53  ;;  %v4470_v57 = vpop.f32.mrb[102].mxu1 }
 0x211   : > { %v1842_v60 = vpop.f32.mrb[103].mxu1  ;;  %v1851_v0 = vadd.f32 %v4470_v57, %v5383_v9  ;;  %v2244_v6 = vmax.f32 %v1848_v58, 0.0 }
 0x212   : > { %v2242_v61 = vmax.f32 %v1840_v56, 0.0  ;;  %v1843_v55 = vadd.f32 %v5383_v9, %v1842_v60  ;;  %4627 = vmatmul.mubr.msk.f32.gmra.mrb[98].mxu0 %vm1468_vm1, %v2241_v54 }
 0x213   : > { %v2245_v12 = vmax.f32 %v1851_v0, 0.0 }
 0x214   : > { %v2243_v5 = vmax.f32 %v1843_v55, 0.0  ;;  %4629 = vmatprep.mubr.msk.f32.mxu0 %vm1468_vm1, %v2242_v61 }
 0x216   : > { %v4473_v7 = vpop.f32.mrb[104].mxu1  ;;  %4630 = vmatmul.mubr.msk.f32.gmra.mrb[100].mxu0 %vm1468_vm1, %v2243_v5 }
 0x217   : > { %v1855_v11 = vpop.f32.mrb[105].mxu1  ;;  %4632 = vmatprep.mubr.msk.f32.mxu0 %vm1468_vm1, %v2244_v6  ;;  %v1864_v18 = vadd.f32 %v4473_v7, %v5383_v9 }
 0x218   : > { %v1856_v14 = vadd.f32 %v5383_v9, %v1855_v11  ;;  %v4474_v15 = vpop.f32.mrb[106].mxu1 }
 0x219   : > { %v1858_v2 = vpop.f32.mrb[107].mxu1  ;;  %v1867_v62 = vadd.f32 %v4474_v15, %v5383_v9  ;;  %v2248_v1 = vmax.f32 %v1864_v18, 0.0 }
 0x21a   : > { %v2246_v31 = vmax.f32 %v1856_v14, 0.0  ;;  %v1859_v34 = vadd.f32 %v5383_v9, %v1858_v2  ;;  %4633 = vmatmul.mubr.msk.f32.gmra.mrb[102].mxu0 %vm1468_vm1, %v2245_v12 }
 0x21b   : > { %v2249_v59 = vmax.f32 %v1867_v62, 0.0 }
 0x21c   : > { %v2247_v17 = vmax.f32 %v1859_v34, 0.0  ;;  %4635 = vmatprep.mubr.msk.f32.mxu0 %vm1468_vm1, %v2246_v31 }
 0x21e   : > { %v4477_v29 = vpop.f32.mrb[108].mxu1  ;;  %4636 = vmatmul.mubr.msk.f32.gmra.mrb[104].mxu0 %vm1468_vm1, %v2247_v17 }
 0x21f   : > { %v1871_v33 = vpop.f32.mrb[109].mxu1  ;;  %4638 = vmatprep.mubr.msk.f32.mxu0 %vm1468_vm1, %v2248_v1  ;;  %v1880_v35 = vadd.f32 %v4477_v29, %v5383_v9 }
 0x220   : > { %v1872_v63 = vadd.f32 %v5383_v9, %v1871_v33  ;;  %v4478_v28 = vpop.f32.mrb[110].mxu1 }
 0x221   : > { %v1874_v4 = vpop.f32.mrb[111].mxu1  ;;  %v1883_v43 = vadd.f32 %v4478_v28, %v5383_v9  ;;  %v2252_v16 = vmax.f32 %v1880_v35, 0.0 }
 0x222   : > { %v2250_v8 = vmax.f32 %v1872_v63, 0.0  ;;  %v1875_v40 = vadd.f32 %v5383_v9, %v1874_v4  ;;  %4639 = vmatmul.mubr.msk.f32.gmra.mrb[106].mxu0 %vm1468_vm1, %v2249_v59 }
 0x223   : > { %v2253_v24 = vmax.f32 %v1883_v43, 0.0 }
 0x224   : > { %v2251_v13 = vmax.f32 %v1875_v40, 0.0  ;;  %4641 = vmatprep.mubr.msk.f32.mxu0 %vm1468_vm1, %v2250_v8 }
 0x226   : > { %v4481_v49 = vpop.f32.mrb[112].mxu1  ;;  %4642 = vmatmul.mubr.msk.f32.gmra.mrb[108].mxu0 %vm1468_vm1, %v2251_v13 }
 0x227   : > { %v1887_v52 = vpop.f32.mrb[113].mxu1  ;;  %4644 = vmatprep.mubr.msk.f32.mxu0 %vm1468_vm1, %v2252_v16  ;;  %v1896_v10 = vadd.f32 %v4481_v49, %v5383_v9 }
 0x228   : > { %v1888_v27 = vadd.f32 %v5383_v9, %v1887_v52  ;;  %v4482_v3 = vpop.f32.mrb[114].mxu1 }
 0x229   : > { %v1890_v51 = vpop.f32.mrb[115].mxu1  ;;  %v1899_v21 = vadd.f32 %v4482_v3, %v5383_v9  ;;  %v2256_v47 = vmax.f32 %v1896_v10, 0.0 }
 0x22a   : > { %v2254_v19 = vmax.f32 %v1888_v27, 0.0  ;;  %v1891_v20 = vadd.f32 %v5383_v9, %v1890_v51  ;;  %4645 = vmatmul.mubr.msk.f32.gmra.mrb[110].mxu0 %vm1468_vm1, %v2253_v24 }
 0x22b   : > { %v2257_v26 = vmax.f32 %v1899_v21, 0.0 }
 0x22c   : > { %v2255_v22 = vmax.f32 %v1891_v20, 0.0  ;;  %4647 = vmatprep.mubr.msk.f32.mxu0 %vm1468_vm1, %v2254_v19 }
 0x22e   : > { %v4485_v23 = vpop.f32.mrb[116].mxu1  ;;  %4648 = vmatmul.mubr.msk.f32.gmra.mrb[112].mxu0 %vm1468_vm1, %v2255_v22 }
 0x22f   : > { %v1903_v25 = vpop.f32.mrb[117].mxu1  ;;  %4650 = vmatprep.mubr.msk.f32.mxu0 %vm1468_vm1, %v2256_v47  ;;  %v1912_v37 = vadd.f32 %v4485_v23, %v5383_v9 }
 0x230   : > { %v1904_v32 = vadd.f32 %v5383_v9, %v1903_v25  ;;  %v4486_v36 = vpop.f32.mrb[118].mxu1 }
 0x231   : > { %v1906_v38 = vpop.f32.mrb[119].mxu1  ;;  %v1915_v42 = vadd.f32 %v4486_v36, %v5383_v9  ;;  %v2260_v30 = vmax.f32 %v1912_v37, 0.0 }
 0x232   : > { %v2258_v39 = vmax.f32 %v1904_v32, 0.0  ;;  %v1907_v41 = vadd.f32 %v5383_v9, %v1906_v38  ;;  %4651 = vmatmul.mubr.msk.f32.gmra.mrb[114].mxu0 %vm1468_vm1, %v2257_v26 }
 0x233   : > { %v2261_v48 = vmax.f32 %v1915_v42, 0.0 }
 0x234   : > { %v2259_v44 = vmax.f32 %v1907_v41, 0.0  ;;  %4653 = vmatprep.mubr.msk.f32.mxu0 %vm1468_vm1, %v2258_v39 }
 0x236   : > { %v4489_v45 = vpop.f32.mrb[120].mxu1  ;;  %4654 = vmatmul.mubr.msk.f32.gmra.mrb[116].mxu0 %vm1468_vm1, %v2259_v44 }
 0x237   : > { %v1919_v46 = vpop.f32.mrb[121].mxu1  ;;  %4656 = vmatprep.mubr.msk.f32.mxu0 %vm1468_vm1, %v2260_v30  ;;  %v1928_v54 = vadd.f32 %v4489_v45, %v5383_v9 }
 0x238   : > { %v1920_v50 = vadd.f32 %v5383_v9, %v1919_v46  ;;  %v4490_v53 = vpop.f32.mrb[122].mxu1 }
 0x239   : > { %v1922_v56 = vpop.f32.mrb[123].mxu1  ;;  %v1931_v60 = vadd.f32 %v4490_v53, %v5383_v9  ;;  %v2264_v55 = vmax.f32 %v1928_v54, 0.0 }
 0x23a   : > { %v2262_v57 = vmax.f32 %v1920_v50, 0.0  ;;  %v1923_v58 = vadd.f32 %v5383_v9, %v1922_v56  ;;  %4657 = vmatmul.mubr.msk.f32.gmra.mrb[118].mxu0 %vm1468_vm1, %v2261_v48 }
 0x23b   : > { %v2265_v6 = vmax.f32 %v1931_v60, 0.0 }
 0x23c   : > { %v2263_v61 = vmax.f32 %v1923_v58, 0.0  ;;  %4659 = vmatprep.mubr.msk.f32.mxu0 %vm1468_vm1, %v2262_v57 }
 0x23e   : > { %v4493_v0 = vpop.f32.mrb[124].mxu1  ;;  %4660 = vmatmul.mubr.msk.f32.gmra.mrb[120].mxu0 %vm1468_vm1, %v2263_v61 }
 0x23f   : > { %v1935_v5 = vpop.f32.mrb[125].mxu1  ;;  %4662 = vmatprep.mubr.msk.f32.mxu0 %vm1468_vm1, %v2264_v55  ;;  %v1944_v12 = vadd.f32 %v4493_v0, %v5383_v9 }
 0x240   : > { %v1936_v7 = vadd.f32 %v5383_v9, %v1935_v5  ;;  %v4494_v11 = vpop.f32.mrb[126].mxu1 }
 0x241   : > { %v1938_v14 = vpop.f32.mrb[127].mxu1  ;;  %v1947_v2 = vadd.f32 %v4494_v11, %v5383_v9  ;;  %v2268_v34 = vmax.f32 %v1944_v12, 0.0 }
 0x242   : > { %v2266_v15 = vmax.f32 %v1936_v7, 0.0  ;;  %v1939_v18 = vadd.f32 %v5383_v9, %v1938_v14  ;;  %4663 = vmatmul.mubr.msk.f32.gmra.mrb[122].mxu0 %vm1468_vm1, %v2265_v6 }
 0x243   : > { %v2269_v1 = vmax.f32 %v1947_v2, 0.0 }
 0x244   : > { %v2267_v31 = vmax.f32 %v1939_v18, 0.0  ;;  %4665 = vmatprep.mubr.msk.f32.mxu0 %vm1468_vm1, %v2266_v15 }
 0x246   : > { %v4497_v62 = vpop.f32.mrb[128].mxu1  ;;  %4666 = vmatmul.mubr.msk.f32.gmra.mrb[124].mxu0 %vm1468_vm1, %v2267_v31 }
 0x247   : > { %v1951_v17 = vpop.f32.mrb[129].mxu1  ;;  %4668 = vmatprep.mubr.msk.f32.mxu0 %vm1468_vm1, %v2268_v34  ;;  %v1960_v59 = vadd.f32 %v4497_v62, %v5383_v9 }
 0x248   : > { %v1952_v29 = vadd.f32 %v5383_v9, %v1951_v17  ;;  %v4498_v33 = vpop.f32.mrb[130].mxu1 }
 0x249   : > { %v1954_v63 = vpop.f32.mrb[131].mxu1  ;;  %v1963_v4 = vadd.f32 %v4498_v33, %v5383_v9  ;;  %v2272_v40 = vmax.f32 %v1960_v59, 0.0 }
 0x24a   : > { %v2270_v28 = vmax.f32 %v1952_v29, 0.0  ;;  %v1955_v35 = vadd.f32 %v5383_v9, %v1954_v63  ;;  %4669 = vmatmul.mubr.msk.f32.gmra.mrb[126].mxu0 %vm1468_vm1, %v2269_v1 }
 0x24b   : > { %v2273_v16 = vmax.f32 %v1963_v4, 0.0 }
 0x24c   : > { %v2271_v8 = vmax.f32 %v1955_v35, 0.0  ;;  %4671 = vmatprep.mubr.msk.f32.mxu0 %vm1468_vm1, %v2270_v28 }
 0x24e   : > { %v4501_v43 = vpop.f32.mrb[132].mxu1  ;;  %4672 = vmatmul.mubr.msk.f32.gmra.mrb[128].mxu0 %vm1468_vm1, %v2271_v8 }
 0x24f   : > { %v1967_v13 = vpop.f32.mrb[133].mxu1  ;;  %4674 = vmatprep.mubr.msk.f32.mxu0 %vm1468_vm1, %v2272_v40  ;;  %v1976_v24 = vadd.f32 %v4501_v43, %v5383_v9 }
 0x250   : > { %v1968_v49 = vadd.f32 %v5383_v9, %v1967_v13  ;;  %v4502_v52 = vpop.f32.mrb[134].mxu1 }
 0x251   : > { %v1970_v27 = vpop.f32.mrb[135].mxu1  ;;  %v1979_v51 = vadd.f32 %v4502_v52, %v5383_v9  ;;  %v2276_v20 = vmax.f32 %v1976_v24, 0.0 }
 0x252   : > { %v2274_v3 = vmax.f32 %v1968_v49, 0.0  ;;  %v1971_v10 = vadd.f32 %v5383_v9, %v1970_v27  ;;  %4675 = vmatmul.mubr.msk.f32.gmra.mrb[130].mxu0 %vm1468_vm1, %v2273_v16 }
 0x253   : > { %v2277_v47 = vmax.f32 %v1979_v51, 0.0 }
 0x254   : > { %v2275_v19 = vmax.f32 %v1971_v10, 0.0  ;;  %4677 = vmatprep.mubr.msk.f32.mxu0 %vm1468_vm1, %v2274_v3 }
 0x256   : > { %v4505_v21 = vpop.f32.mrb[136].mxu1  ;;  %4678 = vmatmul.mubr.msk.f32.gmra.mrb[132].mxu0 %vm1468_vm1, %v2275_v19 }
 0x257   : > { %v1983_v22 = vpop.f32.mrb[137].mxu1  ;;  %4680 = vmatprep.mubr.msk.f32.mxu0 %vm1468_vm1, %v2276_v20  ;;  %v1992_v26 = vadd.f32 %v4505_v21, %v5383_v9 }
 0x258   : > { %v1984_v23 = vadd.f32 %v5383_v9, %v1983_v22  ;;  %v4506_v25 = vpop.f32.mrb[138].mxu1 }
 0x259   : > { %v1986_v32 = vpop.f32.mrb[139].mxu1  ;;  %v1995_v38 = vadd.f32 %v4506_v25, %v5383_v9  ;;  %v2280_v41 = vmax.f32 %v1992_v26, 0.0 }
 0x25a   : > { %v2278_v36 = vmax.f32 %v1984_v23, 0.0  ;;  %v1987_v37 = vadd.f32 %v5383_v9, %v1986_v32  ;;  %4681 = vmatmul.mubr.msk.f32.gmra.mrb[134].mxu0 %vm1468_vm1, %v2277_v47 }
 0x25b   : > { %v2281_v30 = vmax.f32 %v1995_v38, 0.0 }
 0x25c   : > { %v2279_v39 = vmax.f32 %v1987_v37, 0.0  ;;  %4683 = vmatprep.mubr.msk.f32.mxu0 %vm1468_vm1, %v2278_v36 }
 0x25e   : > { %v4509_v42 = vpop.f32.mrb[140].mxu1  ;;  %4684 = vmatmul.mubr.msk.f32.gmra.mrb[136].mxu0 %vm1468_vm1, %v2279_v39 }
 0x25f   : > { %v1999_v44 = vpop.f32.mrb[141].mxu1  ;;  %4686 = vmatprep.mubr.msk.f32.mxu0 %vm1468_vm1, %v2280_v41  ;;  %v2008_v48 = vadd.f32 %v4509_v42, %v5383_v9 }
 0x260   : > { %v2000_v45 = vadd.f32 %v5383_v9, %v1999_v44  ;;  %v4510_v46 = vpop.f32.mrb[142].mxu1 }
 0x261   : > { %v2002_v50 = vpop.f32.mrb[143].mxu1  ;;  %v2011_v56 = vadd.f32 %v4510_v46, %v5383_v9  ;;  %v2284_v58 = vmax.f32 %v2008_v48, 0.0 }
 0x262   : > { %v2282_v53 = vmax.f32 %v2000_v45, 0.0  ;;  %v2003_v54 = vadd.f32 %v5383_v9, %v2002_v50  ;;  %4687 = vmatmul.mubr.msk.f32.gmra.mrb[138].mxu0 %vm1468_vm1, %v2281_v30 }
 0x263   : > { %v2285_v55 = vmax.f32 %v2011_v56, 0.0 }
 0x264   : > { %v2283_v57 = vmax.f32 %v2003_v54, 0.0  ;;  %4689 = vmatprep.mubr.msk.f32.mxu0 %vm1468_vm1, %v2282_v53 }
 0x266   : > { %v4513_v60 = vpop.f32.mrb[144].mxu1  ;;  %4690 = vmatmul.mubr.msk.f32.gmra.mrb[140].mxu0 %vm1468_vm1, %v2283_v57 }
 0x267   : > { %v2015_v61 = vpop.f32.mrb[145].mxu1  ;;  %4692 = vmatprep.mubr.msk.f32.mxu0 %vm1468_vm1, %v2284_v58  ;;  %v2024_v6 = vadd.f32 %v4513_v60, %v5383_v9 }
 0x268   : > { %v2016_v0 = vadd.f32 %v5383_v9, %v2015_v61  ;;  %v4514_v5 = vpop.f32.mrb[146].mxu1 }
 0x269   : > { %v2018_v7 = vpop.f32.mrb[147].mxu1  ;;  %v2027_v14 = vadd.f32 %v4514_v5, %v5383_v9  ;;  %v2288_v18 = vmax.f32 %v2024_v6, 0.0 }
 0x26a   : > { %v2286_v11 = vmax.f32 %v2016_v0, 0.0  ;;  %v2019_v12 = vadd.f32 %v5383_v9, %v2018_v7  ;;  %4693 = vmatmul.mubr.msk.f32.gmra.mrb[142].mxu0 %vm1468_vm1, %v2285_v55 }
 0x26b   : > { %v2289_v34 = vmax.f32 %v2027_v14, 0.0 }
 0x26c   : > { %v2287_v15 = vmax.f32 %v2019_v12, 0.0  ;;  %4695 = vmatprep.mubr.msk.f32.mxu0 %vm1468_vm1, %v2286_v11 }
 0x26e   : > { %v4517_v2 = vpop.f32.mrb[148].mxu1  ;;  %4696 = vmatmul.mubr.msk.f32.gmra.mrb[144].mxu0 %vm1468_vm1, %v2287_v15 }
 0x26f   : > { %v2031_v31 = vpop.f32.mrb[149].mxu1  ;;  %4698 = vmatprep.mubr.msk.f32.mxu0 %vm1468_vm1, %v2288_v18  ;;  %v2040_v1 = vadd.f32 %v4517_v2, %v5383_v9 }
 0x270   : > { %v2032_v62 = vadd.f32 %v5383_v9, %v2031_v31  ;;  %v4518_v17 = vpop.f32.mrb[150].mxu1 }
 0x271   : > { %v2034_v29 = vpop.f32.mrb[151].mxu1  ;;  %v2043_v63 = vadd.f32 %v4518_v17, %v5383_v9  ;;  %v2292_v35 = vmax.f32 %v2040_v1, 0.0 }
 0x272   : > { %v2290_v33 = vmax.f32 %v2032_v62, 0.0  ;;  %v2035_v59 = vadd.f32 %v5383_v9, %v2034_v29  ;;  %4699 = vmatmul.mubr.msk.f32.gmra.mrb[146].mxu0 %vm1468_vm1, %v2289_v34 }
 0x273   : > { %v2293_v40 = vmax.f32 %v2043_v63, 0.0 }
 0x274   : > { %v2291_v28 = vmax.f32 %v2035_v59, 0.0  ;;  %4701 = vmatprep.mubr.msk.f32.mxu0 %vm1468_vm1, %v2290_v33 }
 0x276   : > { %v4521_v4 = vpop.f32.mrb[152].mxu1  ;;  %4702 = vmatmul.mubr.msk.f32.gmra.mrb[148].mxu0 %vm1468_vm1, %v2291_v28 }
 0x277   : > { %v2047_v8 = vpop.f32.mrb[153].mxu1  ;;  %4704 = vmatprep.mubr.msk.f32.mxu0 %vm1468_vm1, %v2292_v35  ;;  %v2056_v16 = vadd.f32 %v4521_v4, %v5383_v9  ;;  %v5618_v35 = vstv %s3431_s20 }
 0x278   : > { %v2048_v43 = vadd.f32 %v5383_v9, %v2047_v8  ;;  %v4522_v13 = vpop.f32.mrb[154].mxu1 }
 0x279   : > { %v2050_v49 = vpop.f32.mrb[155].mxu1  ;;  %v2059_v27 = vadd.f32 %v4522_v13, %v5383_v9  ;;  %v2296_v10 = vmax.f32 %v2056_v16, 0.0 }
 0x27a   : > { %v2294_v52 = vmax.f32 %v2048_v43, 0.0  ;;  %v2051_v24 = vadd.f32 %v5383_v9, %v2050_v49  ;;  %4705 = vmatmul.mubr.msk.f32.gmra.mrb[150].mxu0 %vm1468_vm1, %v2293_v40 }
 0x27b   : > { %v2297_v20 = vmax.f32 %v2059_v27, 0.0 }
 0x27c   : > { %v2295_v3 = vmax.f32 %v2051_v24, 0.0  ;;  %4707 = vmatprep.mubr.msk.f32.mxu0 %vm1468_vm1, %v2294_v52 }
 0x27e   : > { %v4525_v51 = vpop.f32.mrb[156].mxu1  ;;  %4708 = vmatmul.mubr.msk.f32.gmra.mrb[152].mxu0 %vm1468_vm1, %v2295_v3 }
 0x27f   : > { %v2063_v19 = vpop.f32.mrb[157].mxu1  ;;  %4710 = vmatprep.mubr.msk.f32.mxu0 %vm1468_vm1, %v2296_v10  ;;  %v2072_v47 = vadd.f32 %v4525_v51, %v5383_v9 }
 0x280   : > { %v2064_v21 = vadd.f32 %v5383_v9, %v2063_v19  ;;  %v4526_v22 = vpop.f32.mrb[158].mxu1 }
 0x281   : > { %v2066_v23 = vpop.f32.mrb[159].mxu1  ;;  %v2075_v32 = vadd.f32 %v4526_v22, %v5383_v9  ;;  %v2300_v37 = vmax.f32 %v2072_v47, 0.0 }
 0x282   : > { %v2298_v25 = vmax.f32 %v2064_v21, 0.0  ;;  %v2067_v26 = vadd.f32 %v5383_v9, %v2066_v23  ;;  %4711 = vmatmul.mubr.msk.f32.gmra.mrb[154].mxu0 %vm1468_vm1, %v2297_v20 }
 0x283   : > { %v2301_v41 = vmax.f32 %v2075_v32, 0.0 }
 0x284   : > { %v2299_v36 = vmax.f32 %v2067_v26, 0.0  ;;  %4713 = vmatprep.mubr.msk.f32.mxu0 %vm1468_vm1, %v2298_v25 }
 0x286   : > { %v4529_v38 = vpop.f32.mrb[160].mxu1  ;;  %4714 = vmatmul.mubr.msk.f32.gmra.mrb[156].mxu0 %vm1468_vm1, %v2299_v36 }
 0x287   : > { %v2079_v39 = vpop.f32.mrb[161].mxu1  ;;  %4716 = vmatprep.mubr.msk.f32.mxu0 %vm1468_vm1, %v2300_v37  ;;  %v2088_v30 = vadd.f32 %v4529_v38, %v5383_v9 }
 0x288   : > { %v2080_v42 = vadd.f32 %v5383_v9, %v2079_v39  ;;  %v4530_v44 = vpop.f32.mrb[162].mxu1 }
 0x289   : > { %v2082_v45 = vpop.f32.mrb[163].mxu1  ;;  %v2091_v50 = vadd.f32 %v4530_v44, %v5383_v9  ;;  %v2304_v54 = vmax.f32 %v2088_v30, 0.0 }
 0x28a   : > { %v2302_v46 = vmax.f32 %v2080_v42, 0.0  ;;  %v2083_v48 = vadd.f32 %v5383_v9, %v2082_v45  ;;  %4717 = vmatmul.mubr.msk.f32.gmra.mrb[158].mxu0 %vm1468_vm1, %v2301_v41 }
 0x28b   : > { %v2305_v58 = vmax.f32 %v2091_v50, 0.0 }
 0x28c   : > { %v2303_v53 = vmax.f32 %v2083_v48, 0.0  ;;  %4719 = vmatprep.mubr.msk.f32.mxu0 %vm1468_vm1, %v2302_v46 }
 0x28e   : > { %v4533_v56 = vpop.f32.mrb[164].mxu1  ;;  %4720 = vmatmul.mubr.msk.f32.gmra.mrb[160].mxu0 %vm1468_vm1, %v2303_v53 }
 0x28f   : > { %v2095_v57 = vpop.f32.mrb[165].mxu1  ;;  %4722 = vmatprep.mubr.msk.f32.mxu0 %vm1468_vm1, %v2304_v54  ;;  %v2104_v55 = vadd.f32 %v4533_v56, %v5383_v9 }
 0x290   : > { %v2096_v60 = vadd.f32 %v5383_v9, %v2095_v57  ;;  %v4534_v61 = vpop.f32.mrb[166].mxu1 }
 0x291   : > { %v2098_v0 = vpop.f32.mrb[167].mxu1  ;;  %v2107_v7 = vadd.f32 %v4534_v61, %v5383_v9  ;;  %v2308_v12 = vmax.f32 %v2104_v55, 0.0 }
 0x292   : > { %v2306_v5 = vmax.f32 %v2096_v60, 0.0  ;;  %v2099_v6 = vadd.f32 %v5383_v9, %v2098_v0  ;;  %4723 = vmatmul.mubr.msk.f32.gmra.mrb[162].mxu0 %vm1468_vm1, %v2305_v58 }
 0x293   : > { %v2309_v18 = vmax.f32 %v2107_v7, 0.0 }
 0x294   : > { %v2307_v11 = vmax.f32 %v2099_v6, 0.0  ;;  %4725 = vmatprep.mubr.msk.f32.mxu0 %vm1468_vm1, %v2306_v5 }
 0x296   : > { %v4537_v14 = vpop.f32.mrb[168].mxu1  ;;  %4726 = vmatmul.mubr.msk.f32.gmra.mrb[164].mxu0 %vm1468_vm1, %v2307_v11 }
 0x297   : > { %v2111_v15 = vpop.f32.mrb[169].mxu1  ;;  %4728 = vmatprep.mubr.msk.f32.mxu0 %vm1468_vm1, %v2308_v12  ;;  %v2120_v34 = vadd.f32 %v4537_v14, %v5383_v9 }
 0x298   : > { %v2112_v2 = vadd.f32 %v5383_v9, %v2111_v15  ;;  %v4538_v31 = vpop.f32.mrb[170].mxu1 }
 0x299   : > { %v2114_v62 = vpop.f32.mrb[171].mxu1  ;;  %v2123_v29 = vadd.f32 %v4538_v31, %v5383_v9  ;;  %v2312_v59 = vmax.f32 %v2120_v34, 0.0 }
 0x29a   : > { %v2310_v17 = vmax.f32 %v2112_v2, 0.0  ;;  %v2115_v1 = vadd.f32 %v5383_v9, %v2114_v62  ;;  %4729 = vmatmul.mubr.msk.f32.gmra.mrb[166].mxu0 %vm1468_vm1, %v2309_v18  ;;  %v4801_v2 = vld [vmem:[%s6053_s4] ss:$0 sm:$0xff] }
 0x29b   : > { %v2313_v4 = vmax.f32 %v2123_v29, 0.0 }
 0x29c   : > { %v2311_v33 = vmax.f32 %v2115_v1, 0.0  ;;  %4731 = vmatprep.mubr.msk.f32.mxu0 %vm1468_vm1, %v2310_v17 }
 0x29e   : > { %v4541_v63 = vpop.f32.mrb[172].mxu1  ;;  %4732 = vmatmul.mubr.msk.f32.gmra.mrb[168].mxu0 %vm1468_vm1, %v2311_v33 }
 0x29f   : > { %v2127_v28 = vpop.f32.mrb[173].mxu1  ;;  %4734 = vmatprep.mubr.msk.f32.mxu0 %vm1468_vm1, %v2312_v59  ;;  %v2136_v43 = vadd.f32 %v4541_v63, %v5383_v9 }
 0x2a0   : > { %v2128_v8 = vadd.f32 %v5383_v9, %v2127_v28  ;;  %v4542_v40 = vpop.f32.mrb[174].mxu1 }
 0x2a1   : > { %v2130_v13 = vpop.f32.mrb[175].mxu1  ;;  %v4577_v16 = vpop.f32.mrb[64].mxu0  ;;  %v2139_v10 = vadd.f32 %v4542_v40, %v5383_v9  ;;  %v2316_v19 = vmax.f32 %v2136_v43, 0.0 }
 0x2a2   : > { %v2314_v49 = vmax.f32 %v2128_v8, 0.0  ;;  %v2131_v52 = vadd.f32 %v5383_v9, %v2130_v13  ;;  %v3434_v24 = vadd.f32 %v4577_v16, %v5618_v35  ;;  %v2792_v27 = vpop.f32.mrb[65].mxu0  ;;  %4735 = vmatmul.mubr.msk.f32.gmra.mrb[170].mxu0 %vm1468_vm1, %v2313_v4 }
 0x2a3   : > { %v3433_v3 = vadd.f32 %v5618_v35, %v2792_v27  ;;  %v2317_v26 = vmax.f32 %v2139_v10, 0.0 }
 0x2a4   : > { %v2315_v51 = vmax.f32 %v2131_v52, 0.0  ;;  %3563 = vst.msk [vmem:[%s5626_s23 + $0x8] sm:$0xff] %vm3561_vm2, %v3434_v24  ;;  %4737 = vmatprep.mubr.msk.f32.mxu0 %vm1468_vm1, %v2314_v49 }
 0x2a5   : > { %3562 = vst.msk [vmem:[%s5626_s23] sm:$0xff] %vm3561_vm2, %v3433_v3  ;;  %v4580_v20 = vpop.f32.mrb[66].mxu0 }
 0x2a6   : > { %v3436_v21 = vadd.f32 %v4580_v20, %v5618_v35  ;;  %v4545_v22 = vpop.f32.mrb[176].mxu1  ;;  %v2802_v47 = vpop.f32.mrb[67].mxu0  ;;  %4738 = vmatmul.mubr.msk.f32.gmra.mrb[172].mxu0 %vm1468_vm1, %v2315_v51 }
 0x2a7   : > { %v3435_v23 = vadd.f32 %v5618_v35, %v2802_v47  ;;  %v2143_v25 = vpop.f32.mrb[177].mxu1  ;;  %4740 = vmatprep.mubr.msk.f32.mxu0 %vm1468_vm1, %v2316_v19  ;;  %v2152_v37 = vadd.f32 %v4545_v22, %v5383_v9 }
 0x2a8   : > { %3565 = vst.msk [vmem:[%s5626_s23 + $0x18] sm:$0xff] %vm3561_vm2, %v3436_v21  ;;  %v2144_v32 = vadd.f32 %v5383_v9, %v2143_v25  ;;  %v4546_v36 = vpop.f32.mrb[178].mxu1 }
 0x2a9   : > { %3564 = vst.msk [vmem:[%s5626_s23 + $0x10] sm:$0xff] %vm3561_vm2, %v3435_v23  ;;  %v2146_v38 = vpop.f32.mrb[179].mxu1  ;;  %v4583_v39 = vpop.f32.mrb[68].mxu0  ;;  %v2155_v46 = vadd.f32 %v4546_v36, %v5383_v9  ;;  %v2320_v50 = vmax.f32 %v2152_v37, 0.0 }
 0x2aa   : > { %v2318_v41 = vmax.f32 %v2144_v32, 0.0  ;;  %v2147_v42 = vadd.f32 %v5383_v9, %v2146_v38  ;;  %v3438_v44 = vadd.f32 %v4583_v39, %v5618_v35  ;;  %v2812_v30 = vpop.f32.mrb[69].mxu0  ;;  %4741 = vmatmul.mubr.msk.f32.gmra.mrb[174].mxu0 %vm1468_vm1, %v2317_v26 }
 0x2ab   : > { %v3437_v45 = vadd.f32 %v5618_v35, %v2812_v30  ;;  %v2321_v61 = vmax.f32 %v2155_v46, 0.0 }
 0x2ac   : > { %v2319_v48 = vmax.f32 %v2147_v42, 0.0  ;;  %3567 = vst.msk [vmem:[%s5626_s23 + $0x28] sm:$0xff] %vm3561_vm2, %v3438_v44  ;;  %4743 = vmatprep.mubr.msk.f32.mxu0 %vm1468_vm1, %v2318_v41 }
 0x2ad   : > { %3566 = vst.msk [vmem:[%s5626_s23 + $0x20] sm:$0xff] %vm3561_vm2, %v3437_v45  ;;  %v4586_v53 = vpop.f32.mrb[70].mxu0 }
 0x2ae   : > { %v3440_v54 = vadd.f32 %v4586_v53, %v5618_v35  ;;  %v4549_v56 = vpop.f32.mrb[180].mxu1  ;;  %v2822_v57 = vpop.f32.mrb[71].mxu0  ;;  %4744 = vmatmul.mubr.msk.f32.gmra.mrb[176].mxu0 %vm1468_vm1, %v2319_v48 }
 0x2af   : > { %v3439_v58 = vadd.f32 %v5618_v35, %v2822_v57  ;;  %v2159_v60 = vpop.f32.mrb[181].mxu1  ;;  %4746 = vmatprep.mubr.msk.f32.mxu0 %vm1468_vm1, %v2320_v50  ;;  %v2168_v5 = vadd.f32 %v4549_v56, %v5383_v9 }
 0x2b0   : > { %3569 = vst.msk [vmem:[%s5626_s23 + $0x38] sm:$0xff] %vm3561_vm2, %v3440_v54  ;;  %v2160_v55 = vadd.f32 %v5383_v9, %v2159_v60  ;;  %v4550_v0 = vpop.f32.mrb[182].mxu1 }
 0x2b1   : > { %3568 = vst.msk [vmem:[%s5626_s23 + $0x30] sm:$0xff] %vm3561_vm2, %v3439_v58  ;;  %v2162_v6 = vpop.f32.mrb[183].mxu1  ;;  %v4589_v7 = vpop.f32.mrb[72].mxu0  ;;  %v2171_v31 = vadd.f32 %v4801_v2, %v4550_v0 }
 0x2b2   : > { %v2322_v11 = vmax.f32 %v2160_v55, 0.0  ;;  %v2163_v12 = vadd.f32 %v5383_v9, %v2162_v6  ;;  %v3442_v14 = vadd.f32 %v4589_v7, %v5618_v35  ;;  %v2832_v15 = vpop.f32.mrb[73].mxu0  ;;  %4747 = vmatmul.mubr.msk.f32.gmra.mrb[178].mxu0 %vm1468_vm1, %v2321_v61  ;;  %v2324_v9 = vmax.f32 %v2168_v5, 0.0 }
 0x2b3   : > { %v3441_v18 = vadd.f32 %v5618_v35, %v2832_v15  ;;  %v2325_v63 = vmax.f32 %v2171_v31, 0.0 }
 0x2b4   : > { %v2323_v34 = vmax.f32 %v2163_v12, 0.0  ;;  %3571 = vst.msk [vmem:[%s5626_s23 + $0x48] sm:$0xff] %vm3561_vm2, %v3442_v14  ;;  %4749 = vmatprep.mubr.msk.f32.mxu0 %vm1468_vm1, %v2322_v11 }
 0x2b5   : > { %3570 = vst.msk [vmem:[%s5626_s23 + $0x40] sm:$0xff] %vm3561_vm2, %v3441_v18  ;;  %v4592_v62 = vpop.f32.mrb[74].mxu0 }
 0x2b6   : > { %v3444_v17 = vadd.f32 %v4592_v62, %v5618_v35  ;;  %v4553_v1 = vpop.f32.mrb[184].mxu1  ;;  %v2842_v29 = vpop.f32.mrb[75].mxu0  ;;  %4750 = vmatmul.mubr.msk.f32.gmra.mrb[180].mxu0 %vm1468_vm1, %v2323_v34 }
 0x2b7   : > { %v3443_v33 = vadd.f32 %v5618_v35, %v2842_v29  ;;  %v2175_v59 = vpop.f32.mrb[185].mxu1  ;;  %4752 = vmatprep.mubr.msk.f32.mxu0 %vm1468_vm1, %v2324_v9  ;;  %v2184_v8 = vadd.f32 %v4801_v2, %v4553_v1 }
 0x2b8   : > { %3573 = vst.msk [vmem:[%s5626_s23 + $0x58] sm:$0xff] %vm3561_vm2, %v3444_v17  ;;  %v2176_v28 = vadd.f32 %v4801_v2, %v2175_v59  ;;  %v4554_v4 = vpop.f32.mrb[186].mxu1 }
 0x2b9   : > { %3572 = vst.msk [vmem:[%s5626_s23 + $0x50] sm:$0xff] %vm3561_vm2, %v3443_v33  ;;  %v2178_v40 = vpop.f32.mrb[187].mxu1  ;;  %v4595_v43 = vpop.f32.mrb[76].mxu0  ;;  %v2187_v27 = vadd.f32 %v4801_v2, %v4554_v4  ;;  %v2328_v10 = vmax.f32 %v2184_v8, 0.0 }
 0x2ba   : > { %v2326_v13 = vmax.f32 %v2176_v28, 0.0  ;;  %v2179_v16 = vadd.f32 %v4801_v2, %v2178_v40  ;;  %v3446_v49 = vadd.f32 %v4595_v43, %v5618_v35  ;;  %v2852_v52 = vpop.f32.mrb[77].mxu0  ;;  %4753 = vmatmul.mubr.msk.f32.gmra.mrb[182].mxu0 %vm1468_vm1, %v2325_v63 }
 0x2bb   : > { %v3445_v24 = vadd.f32 %v5618_v35, %v2852_v52  ;;  %v2329_v23 = vmax.f32 %v2187_v27, 0.0 }
 0x2bc   : > { %v2327_v3 = vmax.f32 %v2179_v16, 0.0  ;;  %3575 = vst.msk [vmem:[%s5626_s23 + $0x68] sm:$0xff] %vm3561_vm2, %v3446_v49  ;;  %4755 = vmatprep.mubr.msk.f32.mxu0 %vm1468_vm1, %v2326_v13 }
 0x2bd   : > { %3574 = vst.msk [vmem:[%s5626_s23 + $0x60] sm:$0xff] %vm3561_vm2, %v3445_v24  ;;  %v4598_v51 = vpop.f32.mrb[78].mxu0 }
 0x2be   : > { %v3448_v19 = vadd.f32 %v4598_v51, %v5618_v35  ;;  %v4557_v20 = vpop.f32.mrb[188].mxu1  ;;  %v2862_v21 = vpop.f32.mrb[79].mxu0  ;;  %4756 = vmatmul.mubr.msk.f32.gmra.mrb[184].mxu0 %vm1468_vm1, %v2327_v3 }
 0x2bf   : > { %v3447_v22 = vadd.f32 %v5618_v35, %v2862_v21  ;;  %v2191_v47 = vpop.f32.mrb[189].mxu1  ;;  %4758 = vmatprep.mubr.msk.f32.mxu0 %vm1468_vm1, %v2328_v10  ;;  %v2200_v32 = vadd.f32 %v4801_v2, %v4557_v20 }
 0x2c0   : > { %3577 = vst.msk [vmem:[%s5626_s23 + $0x78] sm:$0xff] %vm3561_vm2, %v3448_v19  ;;  %v2192_v25 = vadd.f32 %v4801_v2, %v2191_v47  ;;  %v4558_v26 = vpop.f32.mrb[190].mxu1 }
 0x2c1   : > { %3576 = vst.msk [vmem:[%s5626_s23 + $0x70] sm:$0xff] %vm3561_vm2, %v3447_v22  ;;  %v2194_v36 = vpop.f32.mrb[191].mxu1  ;;  %v4601_v37 = vpop.f32.mrb[80].mxu0  ;;  %v2203_v30 = vadd.f32 %v4801_v2, %v4558_v26  ;;  %v2332_v46 = vmax.f32 %v2200_v32, 0.0 }
 0x2c2   : > { %v2330_v38 = vmax.f32 %v2192_v25, 0.0  ;;  %v2195_v39 = vadd.f32 %v4801_v2, %v2194_v36  ;;  %v3450_v41 = vadd.f32 %v4601_v37, %v5618_v35  ;;  %v2872_v42 = vpop.f32.mrb[81].mxu0  ;;  %4759 = vmatmul.mubr.msk.f32.gmra.mrb[186].mxu0 %vm1468_vm1, %v2329_v23 }
 0x2c3   : > { %v3449_v44 = vadd.f32 %v5618_v35, %v2872_v42  ;;  %v2333_v56 = vmax.f32 %v2203_v30, 0.0 }
 0x2c4   : > { %v2331_v45 = vmax.f32 %v2195_v39, 0.0  ;;  %3579 = vst.msk [vmem:[%s5626_s23 + $0x88] sm:$0xff] %vm3561_vm2, %v3450_v41  ;;  %4761 = vmatprep.mubr.msk.f32.mxu0 %vm1468_vm1, %v2330_v38 }
 0x2c5   : > { %3578 = vst.msk [vmem:[%s5626_s23 + $0x80] sm:$0xff] %vm3561_vm2, %v3449_v44  ;;  %v4604_v48 = vpop.f32.mrb[82].mxu0 }
 0x2c6   : > { %v3452_v50 = vadd.f32 %v4604_v48, %v5618_v35  ;;  %v2882_v53 = vpop.f32.mrb[83].mxu0  ;;  %4762 = vmatmul.mubr.msk.f32.gmra.mrb[188].mxu0 %vm1468_vm1, %v2331_v45 }
 0x2c7   : > { %v3451_v54 = vadd.f32 %v5618_v35, %v2882_v53  ;;  %4764 = vmatprep.mubr.msk.f32.mxu0 %vm1468_vm1, %v2332_v46 }
 0x2c8   : > { %3581 = vst.msk [vmem:[%s5626_s23 + $0x98] sm:$0xff] %vm3561_vm2, %v3452_v50 }
 0x2c9   : > { %3580 = vst.msk [vmem:[%s5626_s23 + $0x90] sm:$0xff] %vm3561_vm2, %v3451_v54  ;;  %v4607_v57 = vpop.f32.mrb[84].mxu0 }
 0x2ca   : > { %v3454_v58 = vadd.f32 %v4607_v57, %v5618_v35  ;;  %v2892_v60 = vpop.f32.mrb[85].mxu0  ;;  %4765 = vmatmul.mubr.msk.f32.gmra.mrb[190].mxu0 %vm1468_vm1, %v2333_v56 }
 0x2cb   : > { %v3453_v61 = vadd.f32 %v5618_v35, %v2892_v60 }
 0x2cc   : > { %3583 = vst.msk [vmem:[%s5626_s23 + $0xa8] sm:$0xff] %vm3561_vm2, %v3454_v58 }
 0x2cd   : > { %3582 = vst.msk [vmem:[%s5626_s23 + $0xa0] sm:$0xff] %vm3561_vm2, %v3453_v61  ;;  %v4610_v55 = vpop.f32.mrb[86].mxu0 }
 0x2ce   : > { %v3456_v0 = vadd.f32 %v4610_v55, %v5618_v35  ;;  %v2902_v5 = vpop.f32.mrb[87].mxu0 }
 0x2cf   : > { %v3455_v6 = vadd.f32 %v5618_v35, %v2902_v5 }
 0x2d0   : > { %3585 = vst.msk [vmem:[%s5626_s23 + $0xb8] sm:$0xff] %vm3561_vm2, %v3456_v0 }
 0x2d1   : > { %3584 = vst.msk [vmem:[%s5626_s23 + $0xb0] sm:$0xff] %vm3561_vm2, %v3455_v6  ;;  %v4613_v7 = vpop.f32.mrb[88].mxu0 }
 0x2d2   : > { %v3458_v11 = vadd.f32 %v4613_v7, %v5618_v35  ;;  %v2912_v12 = vpop.f32.mrb[89].mxu0 }
 0x2d3   : > { %v3457_v14 = vadd.f32 %v5618_v35, %v2912_v12 }
 0x2d4   : > { %3587 = vst.msk [vmem:[%s5626_s23 + $0xc8] sm:$0xff] %vm3561_vm2, %v3458_v11 }
 0x2d5   : > { %3586 = vst.msk [vmem:[%s5626_s23 + $0xc0] sm:$0xff] %vm3561_vm2, %v3457_v14  ;;  %v4616_v15 = vpop.f32.mrb[90].mxu0 }
 0x2d6   : > { %v3460_v18 = vadd.f32 %v4616_v15, %v5618_v35  ;;  %v2922_v2 = vpop.f32.mrb[91].mxu0 }
 0x2d7   : > { %v3459_v31 = vadd.f32 %v5618_v35, %v2922_v2 }
 0x2d8   : > { %3589 = vst.msk [vmem:[%s5626_s23 + $0xd8] sm:$0xff] %vm3561_vm2, %v3460_v18 }
 0x2d9   : > { %3588 = vst.msk [vmem:[%s5626_s23 + $0xd0] sm:$0xff] %vm3561_vm2, %v3459_v31  ;;  %v4619_v34 = vpop.f32.mrb[92].mxu0 }
 0x2da   : > { %v3462_v9 = vadd.f32 %v4619_v34, %v5618_v35  ;;  %v2932_v62 = vpop.f32.mrb[93].mxu0 }
 0x2db   : > { %v3461_v17 = vadd.f32 %v5618_v35, %v2932_v62 }
 0x2dc   : > { %3591 = vst.msk [vmem:[%s5626_s23 + $0xe8] sm:$0xff] %vm3561_vm2, %v3462_v9 }
 0x2dd   : > { %3590 = vst.msk [vmem:[%s5626_s23 + $0xe0] sm:$0xff] %vm3561_vm2, %v3461_v17  ;;  %v4622_v1 = vpop.f32.mrb[94].mxu0 }
 0x2de   : > { %v3464_v29 = vadd.f32 %v4622_v1, %v5618_v35  ;;  %v2942_v33 = vpop.f32.mrb[95].mxu0 }
 0x2df   : > { %v3463_v59 = vadd.f32 %v5618_v35, %v2942_v33 }
 0x2e0   : > { %3593 = vst.msk [vmem:[%s5626_s23 + $0xf8] sm:$0xff] %vm3561_vm2, %v3464_v29 }
 0x2e1   : > { %3592 = vst.msk [vmem:[%s5626_s23 + $0xf0] sm:$0xff] %vm3561_vm2, %v3463_v59  ;;  %v4625_v63 = vpop.f32.mrb[96].mxu0 }
 0x2e2   : > { %v3466_v28 = vadd.f32 %v4625_v63, %v5618_v35  ;;  %v2952_v4 = vpop.f32.mrb[97].mxu0 }
 0x2e3   : > { %v3465_v8 = vadd.f32 %v5618_v35, %v2952_v4 }
 0x2e4   : > { %3595 = vst.msk [vmem:[%s5626_s23 + $0x108] sm:$0xff] %vm3561_vm2, %v3466_v28 }
 0x2e5   : > { %3594 = vst.msk [vmem:[%s5626_s23 + $0x100] sm:$0xff] %vm3561_vm2, %v3465_v8  ;;  %v4628_v40 = vpop.f32.mrb[98].mxu0 }
 0x2e6   : > { %v3468_v43 = vadd.f32 %v4628_v40, %v5618_v35  ;;  %v2962_v13 = vpop.f32.mrb[99].mxu0 }
 0x2e7   : > { %v3467_v16 = vadd.f32 %v5618_v35, %v2962_v13 }
 0x2e8   : > { %3597 = vst.msk [vmem:[%s5626_s23 + $0x118] sm:$0xff] %vm3561_vm2, %v3468_v43 }
 0x2e9   : > { %3596 = vst.msk [vmem:[%s5626_s23 + $0x110] sm:$0xff] %vm3561_vm2, %v3467_v16  ;;  %v4631_v49 = vpop.f32.mrb[100].mxu0 }
 0x2ea   : > { %v3470_v52 = vadd.f32 %v4631_v49, %v5618_v35  ;;  %v2972_v24 = vpop.f32.mrb[101].mxu0 }
 0x2eb   : > { %v3469_v27 = vadd.f32 %v5618_v35, %v2972_v24 }
 0x2ec   : > { %3599 = vst.msk [vmem:[%s5626_s23 + $0x128] sm:$0xff] %vm3561_vm2, %v3470_v52 }
 0x2ed   : > { %3598 = vst.msk [vmem:[%s5626_s23 + $0x120] sm:$0xff] %vm3561_vm2, %v3469_v27  ;;  %v4634_v3 = vpop.f32.mrb[102].mxu0 }
 0x2ee   : > { %v3472_v10 = vadd.f32 %v4634_v3, %v5618_v35  ;;  %v2982_v51 = vpop.f32.mrb[103].mxu0 }
 0x2ef   : > { %v3471_v19 = vadd.f32 %v5618_v35, %v2982_v51 }
 0x2f0   : > { %3601 = vst.msk [vmem:[%s5626_s23 + $0x138] sm:$0xff] %vm3561_vm2, %v3472_v10 }
 0x2f1   : > { %3600 = vst.msk [vmem:[%s5626_s23 + $0x130] sm:$0xff] %vm3561_vm2, %v3471_v19  ;;  %v4637_v20 = vpop.f32.mrb[104].mxu0 }
 0x2f2   : > { %v3474_v21 = vadd.f32 %v4637_v20, %v5618_v35  ;;  %v2992_v22 = vpop.f32.mrb[105].mxu0 }
 0x2f3   : > { %v3473_v47 = vadd.f32 %v5618_v35, %v2992_v22 }
 0x2f4   : > { %3603 = vst.msk [vmem:[%s5626_s23 + $0x148] sm:$0xff] %vm3561_vm2, %v3474_v21 }
 0x2f5   : > { %3602 = vst.msk [vmem:[%s5626_s23 + $0x140] sm:$0xff] %vm3561_vm2, %v3473_v47  ;;  %v4640_v23 = vpop.f32.mrb[106].mxu0 }
 0x2f6   : > { %v3476_v25 = vadd.f32 %v4640_v23, %v5618_v35  ;;  %v3002_v26 = vpop.f32.mrb[107].mxu0 }
 0x2f7   : > { %v3475_v32 = vadd.f32 %v5618_v35, %v3002_v26 }
 0x2f8   : > { %3605 = vst.msk [vmem:[%s5626_s23 + $0x158] sm:$0xff] %vm3561_vm2, %v3476_v25 }
 0x2f9   : > { %3604 = vst.msk [vmem:[%s5626_s23 + $0x150] sm:$0xff] %vm3561_vm2, %v3475_v32  ;;  %v4643_v36 = vpop.f32.mrb[108].mxu0 }
 0x2fa   : > { %v3478_v37 = vadd.f32 %v4643_v36, %v5618_v35  ;;  %v3012_v38 = vpop.f32.mrb[109].mxu0 }
 0x2fb   : > { %v3477_v39 = vadd.f32 %v5618_v35, %v3012_v38 }
 0x2fc   : > { %3607 = vst.msk [vmem:[%s5626_s23 + $0x168] sm:$0xff] %vm3561_vm2, %v3478_v37 }
 0x2fd   : > { %3606 = vst.msk [vmem:[%s5626_s23 + $0x160] sm:$0xff] %vm3561_vm2, %v3477_v39  ;;  %v4646_v41 = vpop.f32.mrb[110].mxu0 }
 0x2fe   : > { %v3480_v42 = vadd.f32 %v4646_v41, %v5618_v35  ;;  %v3022_v44 = vpop.f32.mrb[111].mxu0 }
 0x2ff   : > { %v3479_v30 = vadd.f32 %v5618_v35, %v3022_v44 }
 0x300   : > { %3609 = vst.msk [vmem:[%s5626_s23 + $0x178] sm:$0xff] %vm3561_vm2, %v3480_v42 }
 0x301   : > { %3608 = vst.msk [vmem:[%s5626_s23 + $0x170] sm:$0xff] %vm3561_vm2, %v3479_v30  ;;  %v4649_v45 = vpop.f32.mrb[112].mxu0 }
 0x302   : > { %v3482_v46 = vadd.f32 %v4649_v45, %v5618_v35  ;;  %v3032_v48 = vpop.f32.mrb[113].mxu0 }
 0x303   : > { %v3481_v50 = vadd.f32 %v5618_v35, %v3032_v48 }
 0x304   : > { %3611 = vst.msk [vmem:[%s5626_s23 + $0x188] sm:$0xff] %vm3561_vm2, %v3482_v46 }
 0x305   : > { %3610 = vst.msk [vmem:[%s5626_s23 + $0x180] sm:$0xff] %vm3561_vm2, %v3481_v50  ;;  %v4652_v53 = vpop.f32.mrb[114].mxu0 }
 0x306   : > { %v3484_v54 = vadd.f32 %v4652_v53, %v5618_v35  ;;  %v3042_v56 = vpop.f32.mrb[115].mxu0 }
 0x307   : > { %v3483_v57 = vadd.f32 %v5618_v35, %v3042_v56 }
 0x308   : > { %3613 = vst.msk [vmem:[%s5626_s23 + $0x198] sm:$0xff] %vm3561_vm2, %v3484_v54 }
 0x309   : > { %3612 = vst.msk [vmem:[%s5626_s23 + $0x190] sm:$0xff] %vm3561_vm2, %v3483_v57  ;;  %v4655_v58 = vpop.f32.mrb[116].mxu0 }
 0x30a   : > { %v3486_v60 = vadd.f32 %v4655_v58, %v5618_v35  ;;  %v3052_v61 = vpop.f32.mrb[117].mxu0 }
 0x30b   : > { %v3485_v55 = vadd.f32 %v5618_v35, %v3052_v61 }
 0x30c   : > { %3615 = vst.msk [vmem:[%s5626_s23 + $0x1a8] sm:$0xff] %vm3561_vm2, %v3486_v60 }
 0x30d   : > { %3614 = vst.msk [vmem:[%s5626_s23 + $0x1a0] sm:$0xff] %vm3561_vm2, %v3485_v55  ;;  %v4658_v0 = vpop.f32.mrb[118].mxu0 }
 0x30e   : > { %v3488_v5 = vadd.f32 %v4658_v0, %v5618_v35  ;;  %v3062_v6 = vpop.f32.mrb[119].mxu0 }
 0x30f   : > { %v3487_v7 = vadd.f32 %v5618_v35, %v3062_v6 }
 0x310   : > { %3617 = vst.msk [vmem:[%s5626_s23 + $0x1b8] sm:$0xff] %vm3561_vm2, %v3488_v5 }
 0x311   : > { %3616 = vst.msk [vmem:[%s5626_s23 + $0x1b0] sm:$0xff] %vm3561_vm2, %v3487_v7  ;;  %v4661_v11 = vpop.f32.mrb[120].mxu0 }
 0x312   : > { %v3490_v12 = vadd.f32 %v4661_v11, %v5618_v35  ;;  %v3072_v14 = vpop.f32.mrb[121].mxu0 }
 0x313   : > { %v3489_v15 = vadd.f32 %v5618_v35, %v3072_v14 }
 0x314   : > { %3619 = vst.msk [vmem:[%s5626_s23 + $0x1c8] sm:$0xff] %vm3561_vm2, %v3490_v12 }
 0x315   : > { %3618 = vst.msk [vmem:[%s5626_s23 + $0x1c0] sm:$0xff] %vm3561_vm2, %v3489_v15  ;;  %v4664_v18 = vpop.f32.mrb[122].mxu0 }
 0x316   : > { %v3492_v2 = vadd.f32 %v4664_v18, %v5618_v35  ;;  %v3082_v31 = vpop.f32.mrb[123].mxu0 }
 0x317   : > { %v3491_v34 = vadd.f32 %v5618_v35, %v3082_v31 }
 0x318   : > { %3621 = vst.msk [vmem:[%s5626_s23 + $0x1d8] sm:$0xff] %vm3561_vm2, %v3492_v2 }
 0x319   : > { %3620 = vst.msk [vmem:[%s5626_s23 + $0x1d0] sm:$0xff] %vm3561_vm2, %v3491_v34  ;;  %v4667_v9 = vpop.f32.mrb[124].mxu0 }
 0x31a   : > { %v3494_v62 = vadd.f32 %v4667_v9, %v5618_v35  ;;  %v3092_v17 = vpop.f32.mrb[125].mxu0 }
 0x31b   : > { %v3493_v1 = vadd.f32 %v5618_v35, %v3092_v17 }
 0x31c   : > { %3623 = vst.msk [vmem:[%s5626_s23 + $0x1e8] sm:$0xff] %vm3561_vm2, %v3494_v62 }
 0x31d   : > { %3622 = vst.msk [vmem:[%s5626_s23 + $0x1e0] sm:$0xff] %vm3561_vm2, %v3493_v1  ;;  %v4670_v29 = vpop.f32.mrb[126].mxu0 }
 0x31e   : > { %v3496_v33 = vadd.f32 %v4670_v29, %v5618_v35  ;;  %v3102_v59 = vpop.f32.mrb[127].mxu0 }
 0x31f   : > { %v3495_v63 = vadd.f32 %v5618_v35, %v3102_v59 }
 0x320   : > { %3625 = vst.msk [vmem:[%s5626_s23 + $0x1f8] sm:$0xff] %vm3561_vm2, %v3496_v33 }
 0x321   : > { %3624 = vst.msk [vmem:[%s5626_s23 + $0x1f0] sm:$0xff] %vm3561_vm2, %v3495_v63  ;;  %v4673_v28 = vpop.f32.mrb[128].mxu0 }
 0x322   : > { %v3498_v4 = vadd.f32 %v4673_v28, %v5618_v35  ;;  %v3112_v8 = vpop.f32.mrb[129].mxu0 }
 0x323   : > { %v3497_v40 = vadd.f32 %v5618_v35, %v3112_v8 }
 0x324   : > { %3627 = vst.msk [vmem:[%s5626_s23 + $0x208] sm:$0xff] %vm3561_vm2, %v3498_v4 }
 0x325   : > { %3626 = vst.msk [vmem:[%s5626_s23 + $0x200] sm:$0xff] %vm3561_vm2, %v3497_v40  ;;  %v4676_v43 = vpop.f32.mrb[130].mxu0 }
 0x326   : > { %v3500_v13 = vadd.f32 %v4676_v43, %v5618_v35  ;;  %v3122_v16 = vpop.f32.mrb[131].mxu0 }
 0x327   : > { %v3499_v49 = vadd.f32 %v5618_v35, %v3122_v16 }
 0x328   : > { %3629 = vst.msk [vmem:[%s5626_s23 + $0x218] sm:$0xff] %vm3561_vm2, %v3500_v13 }
 0x329   : > { %3628 = vst.msk [vmem:[%s5626_s23 + $0x210] sm:$0xff] %vm3561_vm2, %v3499_v49  ;;  %v4679_v52 = vpop.f32.mrb[132].mxu0 }
 0x32a   : > { %v3502_v24 = vadd.f32 %v4679_v52, %v5618_v35  ;;  %v3132_v27 = vpop.f32.mrb[133].mxu0 }
 0x32b   : > { %v3501_v3 = vadd.f32 %v5618_v35, %v3132_v27 }
 0x32c   : > { %3631 = vst.msk [vmem:[%s5626_s23 + $0x228] sm:$0xff] %vm3561_vm2, %v3502_v24 }
 0x32d   : > { %3630 = vst.msk [vmem:[%s5626_s23 + $0x220] sm:$0xff] %vm3561_vm2, %v3501_v3  ;;  %v4682_v10 = vpop.f32.mrb[134].mxu0 }
 0x32e   : > { %v3504_v51 = vadd.f32 %v4682_v10, %v5618_v35  ;;  %v3142_v19 = vpop.f32.mrb[135].mxu0 }
 0x32f   : > { %v3503_v20 = vadd.f32 %v5618_v35, %v3142_v19 }
 0x330   : > { %3633 = vst.msk [vmem:[%s5626_s23 + $0x238] sm:$0xff] %vm3561_vm2, %v3504_v51 }
 0x331   : > { %3632 = vst.msk [vmem:[%s5626_s23 + $0x230] sm:$0xff] %vm3561_vm2, %v3503_v20  ;;  %v4685_v21 = vpop.f32.mrb[136].mxu0 }
 0x332   : > { %v3506_v22 = vadd.f32 %v4685_v21, %v5618_v35  ;;  %v3152_v47 = vpop.f32.mrb[137].mxu0 }
 0x333   : > { %v3505_v23 = vadd.f32 %v5618_v35, %v3152_v47 }
 0x334   : > { %3635 = vst.msk [vmem:[%s5626_s23 + $0x248] sm:$0xff] %vm3561_vm2, %v3506_v22 }
 0x335   : > { %3634 = vst.msk [vmem:[%s5626_s23 + $0x240] sm:$0xff] %vm3561_vm2, %v3505_v23  ;;  %v4688_v25 = vpop.f32.mrb[138].mxu0 }
 0x336   : > { %v3508_v26 = vadd.f32 %v4688_v25, %v5618_v35  ;;  %v3162_v32 = vpop.f32.mrb[139].mxu0 }
 0x337   : > { %v3507_v36 = vadd.f32 %v5618_v35, %v3162_v32 }
 0x338   : > { %3637 = vst.msk [vmem:[%s5626_s23 + $0x258] sm:$0xff] %vm3561_vm2, %v3508_v26 }
 0x339   : > { %3636 = vst.msk [vmem:[%s5626_s23 + $0x250] sm:$0xff] %vm3561_vm2, %v3507_v36  ;;  %v4691_v37 = vpop.f32.mrb[140].mxu0 }
 0x33a   : > { %v3510_v38 = vadd.f32 %v4691_v37, %v5618_v35  ;;  %v3172_v39 = vpop.f32.mrb[141].mxu0 }
 0x33b   : > { %v3509_v41 = vadd.f32 %v5618_v35, %v3172_v39 }
 0x33c   : > { %3639 = vst.msk [vmem:[%s5626_s23 + $0x268] sm:$0xff] %vm3561_vm2, %v3510_v38 }
 0x33d   : > { %3638 = vst.msk [vmem:[%s5626_s23 + $0x260] sm:$0xff] %vm3561_vm2, %v3509_v41  ;;  %v4694_v42 = vpop.f32.mrb[142].mxu0 }
 0x33e   : > { %v3512_v44 = vadd.f32 %v4694_v42, %v5618_v35  ;;  %v3182_v30 = vpop.f32.mrb[143].mxu0 }
 0x33f   : > { %v3511_v45 = vadd.f32 %v5618_v35, %v3182_v30 }
 0x340   : > { %3641 = vst.msk [vmem:[%s5626_s23 + $0x278] sm:$0xff] %vm3561_vm2, %v3512_v44 }
 0x341   : > { %3640 = vst.msk [vmem:[%s5626_s23 + $0x270] sm:$0xff] %vm3561_vm2, %v3511_v45  ;;  %v4697_v46 = vpop.f32.mrb[144].mxu0 }
 0x342   : > { %v3514_v48 = vadd.f32 %v4697_v46, %v5618_v35  ;;  %v3192_v50 = vpop.f32.mrb[145].mxu0 }
 0x343   : > { %v3513_v53 = vadd.f32 %v5618_v35, %v3192_v50 }
 0x344   : > { %3643 = vst.msk [vmem:[%s5626_s23 + $0x288] sm:$0xff] %vm3561_vm2, %v3514_v48 }
 0x345   : > { %3642 = vst.msk [vmem:[%s5626_s23 + $0x280] sm:$0xff] %vm3561_vm2, %v3513_v53  ;;  %v4700_v54 = vpop.f32.mrb[146].mxu0 }
 0x346   : > { %v3516_v56 = vadd.f32 %v4700_v54, %v5618_v35  ;;  %v3202_v57 = vpop.f32.mrb[147].mxu0 }
 0x347   : > { %v3515_v58 = vadd.f32 %v5618_v35, %v3202_v57 }
 0x348   : > { %3645 = vst.msk [vmem:[%s5626_s23 + $0x298] sm:$0xff] %vm3561_vm2, %v3516_v56 }
 0x349   : > { %3644 = vst.msk [vmem:[%s5626_s23 + $0x290] sm:$0xff] %vm3561_vm2, %v3515_v58  ;;  %v4703_v60 = vpop.f32.mrb[148].mxu0 }
 0x34a   : > { %v3518_v61 = vadd.f32 %v4703_v60, %v5618_v35  ;;  %v3212_v55 = vpop.f32.mrb[149].mxu0 }
 0x34b   : > { %v3517_v0 = vadd.f32 %v5618_v35, %v3212_v55 }
 0x34c   : > { %3647 = vst.msk [vmem:[%s5626_s23 + $0x2a8] sm:$0xff] %vm3561_vm2, %v3518_v61 }
 0x34d   : > { %3646 = vst.msk [vmem:[%s5626_s23 + $0x2a0] sm:$0xff] %vm3561_vm2, %v3517_v0  ;;  %v4706_v5 = vpop.f32.mrb[150].mxu0 }
 0x34e   : > { %v3520_v6 = vadd.f32 %v4706_v5, %v5618_v35  ;;  %v3222_v7 = vpop.f32.mrb[151].mxu0 }
 0x34f   : > { %v3519_v11 = vadd.f32 %v5618_v35, %v3222_v7 }
 0x350   : > { %3649 = vst.msk [vmem:[%s5626_s23 + $0x2b8] sm:$0xff] %vm3561_vm2, %v3520_v6 }
 0x351   : > { %3648 = vst.msk [vmem:[%s5626_s23 + $0x2b0] sm:$0xff] %vm3561_vm2, %v3519_v11  ;;  %v4709_v12 = vpop.f32.mrb[152].mxu0 }
 0x352   : > { %v3522_v14 = vadd.f32 %v4709_v12, %v5618_v35  ;;  %v3232_v15 = vpop.f32.mrb[153].mxu0 }
 0x353   : > { %v3521_v18 = vadd.f32 %v5618_v35, %v3232_v15 }
 0x354   : > { %3651 = vst.msk [vmem:[%s5626_s23 + $0x2c8] sm:$0xff] %vm3561_vm2, %v3522_v14 }
 0x355   : > { %3650 = vst.msk [vmem:[%s5626_s23 + $0x2c0] sm:$0xff] %vm3561_vm2, %v3521_v18  ;;  %v4712_v2 = vpop.f32.mrb[154].mxu0 }
 0x356   : > { %v3524_v31 = vadd.f32 %v4712_v2, %v5618_v35  ;;  %v3242_v34 = vpop.f32.mrb[155].mxu0 }
 0x357   : > { %v3523_v9 = vadd.f32 %v5618_v35, %v3242_v34 }
 0x358   : > { %3653 = vst.msk [vmem:[%s5626_s23 + $0x2d8] sm:$0xff] %vm3561_vm2, %v3524_v31 }
 0x359   : > { %3652 = vst.msk [vmem:[%s5626_s23 + $0x2d0] sm:$0xff] %vm3561_vm2, %v3523_v9  ;;  %v4715_v62 = vpop.f32.mrb[156].mxu0 }
 0x35a   : > { %v3526_v17 = vadd.f32 %v4715_v62, %v5618_v35  ;;  %v3252_v1 = vpop.f32.mrb[157].mxu0 }
 0x35b   : > { %v3525_v29 = vadd.f32 %v5618_v35, %v3252_v1 }
 0x35c   : > { %3655 = vst.msk [vmem:[%s5626_s23 + $0x2e8] sm:$0xff] %vm3561_vm2, %v3526_v17 }
 0x35d   : > { %3654 = vst.msk [vmem:[%s5626_s23 + $0x2e0] sm:$0xff] %vm3561_vm2, %v3525_v29  ;;  %v4718_v33 = vpop.f32.mrb[158].mxu0 }
 0x35e   : > { %v3528_v59 = vadd.f32 %v4718_v33, %v5618_v35  ;;  %v3262_v63 = vpop.f32.mrb[159].mxu0 }
 0x35f   : > { %v3527_v28 = vadd.f32 %v5618_v35, %v3262_v63 }
 0x360   : > { %3657 = vst.msk [vmem:[%s5626_s23 + $0x2f8] sm:$0xff] %vm3561_vm2, %v3528_v59 }
 0x361   : > { %3656 = vst.msk [vmem:[%s5626_s23 + $0x2f0] sm:$0xff] %vm3561_vm2, %v3527_v28  ;;  %v4721_v4 = vpop.f32.mrb[160].mxu0 }
 0x362   : > { %v3530_v8 = vadd.f32 %v4721_v4, %v5618_v35  ;;  %v3272_v40 = vpop.f32.mrb[161].mxu0 }
 0x363   : > { %v3529_v43 = vadd.f32 %v5618_v35, %v3272_v40 }
 0x364   : > { %3659 = vst.msk [vmem:[%s5626_s23 + $0x308] sm:$0xff] %vm3561_vm2, %v3530_v8 }
 0x365   : > { %3658 = vst.msk [vmem:[%s5626_s23 + $0x300] sm:$0xff] %vm3561_vm2, %v3529_v43  ;;  %v4724_v13 = vpop.f32.mrb[162].mxu0 }
 0x366   : > { %v3532_v16 = vadd.f32 %v4724_v13, %v5618_v35  ;;  %v3282_v49 = vpop.f32.mrb[163].mxu0 }
 0x367   : > { %v3531_v52 = vadd.f32 %v5618_v35, %v3282_v49 }
 0x368   : > { %3661 = vst.msk [vmem:[%s5626_s23 + $0x318] sm:$0xff] %vm3561_vm2, %v3532_v16 }
 0x369   : > { %3660 = vst.msk [vmem:[%s5626_s23 + $0x310] sm:$0xff] %vm3561_vm2, %v3531_v52  ;;  %v4727_v24 = vpop.f32.mrb[164].mxu0 }
 0x36a   : > { %v3534_v27 = vadd.f32 %v4727_v24, %v5618_v35  ;;  %v3292_v3 = vpop.f32.mrb[165].mxu0 }
 0x36b   : > { %v3533_v10 = vadd.f32 %v5618_v35, %v3292_v3 }
 0x36c   : > { %3663 = vst.msk [vmem:[%s5626_s23 + $0x328] sm:$0xff] %vm3561_vm2, %v3534_v27 }
 0x36d   : > { %3662 = vst.msk [vmem:[%s5626_s23 + $0x320] sm:$0xff] %vm3561_vm2, %v3533_v10  ;;  %v4730_v51 = vpop.f32.mrb[166].mxu0 }
 0x36e   : > { %v3536_v19 = vadd.f32 %v4730_v51, %v5618_v35  ;;  %v3302_v20 = vpop.f32.mrb[167].mxu0 }
 0x36f   : > { %v3535_v21 = vadd.f32 %v5618_v35, %v3302_v20 }
 0x370   : > { %3665 = vst.msk [vmem:[%s5626_s23 + $0x338] sm:$0xff] %vm3561_vm2, %v3536_v19 }
 0x371   : > { %3664 = vst.msk [vmem:[%s5626_s23 + $0x330] sm:$0xff] %vm3561_vm2, %v3535_v21  ;;  %v4733_v22 = vpop.f32.mrb[168].mxu0 }
 0x372   : > { %v3538_v47 = vadd.f32 %v4733_v22, %v5618_v35  ;;  %v3312_v23 = vpop.f32.mrb[169].mxu0 }
 0x373   : > { %v3537_v25 = vadd.f32 %v5618_v35, %v3312_v23 }
 0x374   : > { %3667 = vst.msk [vmem:[%s5626_s23 + $0x348] sm:$0xff] %vm3561_vm2, %v3538_v47 }
 0x375   : > { %3666 = vst.msk [vmem:[%s5626_s23 + $0x340] sm:$0xff] %vm3561_vm2, %v3537_v25  ;;  %v4736_v26 = vpop.f32.mrb[170].mxu0 }
 0x376   : > { %v3540_v32 = vadd.f32 %v4736_v26, %v5618_v35  ;;  %v3322_v36 = vpop.f32.mrb[171].mxu0 }
 0x377   : > { %v3539_v37 = vadd.f32 %v5618_v35, %v3322_v36 }
 0x378   : > { %3669 = vst.msk [vmem:[%s5626_s23 + $0x358] sm:$0xff] %vm3561_vm2, %v3540_v32 }
 0x379   : > { %3668 = vst.msk [vmem:[%s5626_s23 + $0x350] sm:$0xff] %vm3561_vm2, %v3539_v37  ;;  %v4739_v38 = vpop.f32.mrb[172].mxu0 }
 0x37a   : > { %v3542_v39 = vadd.f32 %v4739_v38, %v5618_v35  ;;  %v3332_v41 = vpop.f32.mrb[173].mxu0 }
 0x37b   : > { %v3541_v42 = vadd.f32 %v5618_v35, %v3332_v41 }
 0x37c   : > { %3671 = vst.msk [vmem:[%s5626_s23 + $0x368] sm:$0xff] %vm3561_vm2, %v3542_v39 }
 0x37d   : > { %3670 = vst.msk [vmem:[%s5626_s23 + $0x360] sm:$0xff] %vm3561_vm2, %v3541_v42  ;;  %v4742_v44 = vpop.f32.mrb[174].mxu0 }
 0x37e   : > { %v3544_v30 = vadd.f32 %v4742_v44, %v5618_v35  ;;  %v3342_v45 = vpop.f32.mrb[175].mxu0 }
 0x37f   : > { %v3543_v46 = vadd.f32 %v5618_v35, %v3342_v45 }
 0x380   : > { %3673 = vst.msk [vmem:[%s5626_s23 + $0x378] sm:$0xff] %vm3561_vm2, %v3544_v30 }
 0x381   : > { %3672 = vst.msk [vmem:[%s5626_s23 + $0x370] sm:$0xff] %vm3561_vm2, %v3543_v46  ;;  %v4745_v48 = vpop.f32.mrb[176].mxu0 }
 0x382   : > { %v3546_v50 = vadd.f32 %v4745_v48, %v5618_v35  ;;  %v3352_v53 = vpop.f32.mrb[177].mxu0 }
 0x383   : > { %v3545_v54 = vadd.f32 %v5618_v35, %v3352_v53 }
 0x384   : > { %3675 = vst.msk [vmem:[%s5626_s23 + $0x388] sm:$0xff] %vm3561_vm2, %v3546_v50 }
 0x385   : > { %3674 = vst.msk [vmem:[%s5626_s23 + $0x380] sm:$0xff] %vm3561_vm2, %v3545_v54  ;;  %v4748_v56 = vpop.f32.mrb[178].mxu0 }
 0x386   : > { %v3548_v57 = vadd.f32 %v4748_v56, %v5618_v35  ;;  %v3362_v58 = vpop.f32.mrb[179].mxu0 }
 0x387   : > { %v3547_v60 = vadd.f32 %v5618_v35, %v3362_v58 }
 0x388   : > { %3677 = vst.msk [vmem:[%s5626_s23 + $0x398] sm:$0xff] %vm3561_vm2, %v3548_v57 }
 0x389   : > { %3676 = vst.msk [vmem:[%s5626_s23 + $0x390] sm:$0xff] %vm3561_vm2, %v3547_v60  ;;  %v4751_v61 = vpop.f32.mrb[180].mxu0 }
 0x38a   : > { %v3550_v55 = vadd.f32 %v4751_v61, %v5618_v35  ;;  %v3372_v0 = vpop.f32.mrb[181].mxu0 }
 0x38b   : > { %v3549_v5 = vadd.f32 %v5618_v35, %v3372_v0 }
 0x38c   : > { %3679 = vst.msk [vmem:[%s5626_s23 + $0x3a8] sm:$0xff] %vm3561_vm2, %v3550_v55 }
 0x38d   : > { %3678 = vst.msk [vmem:[%s5626_s23 + $0x3a0] sm:$0xff] %vm3561_vm2, %v3549_v5  ;;  %v4754_v6 = vpop.f32.mrb[182].mxu0 }
 0x38e   : > { %v3552_v7 = vadd.f32 %v4754_v6, %v5618_v35  ;;  %v3382_v11 = vpop.f32.mrb[183].mxu0 }
 0x38f   : > { %v3551_v12 = vadd.f32 %v5618_v35, %v3382_v11 }
 0x390   : > { %3681 = vst.msk [vmem:[%s5626_s23 + $0x3b8] sm:$0xff] %vm3561_vm2, %v3552_v7 }
 0x391   : > { %3680 = vst.msk [vmem:[%s5626_s23 + $0x3b0] sm:$0xff] %vm3561_vm2, %v3551_v12  ;;  %v4757_v14 = vpop.f32.mrb[184].mxu0 }
 0x392   : > { %v3554_v15 = vadd.f32 %v4757_v14, %v5618_v35  ;;  %v3392_v18 = vpop.f32.mrb[185].mxu0 }
 0x393   : > { %v3553_v2 = vadd.f32 %v5618_v35, %v3392_v18 }
 0x394   : > { %3683 = vst.msk [vmem:[%s5626_s23 + $0x3c8] sm:$0xff] %vm3561_vm2, %v3554_v15 }
 0x395   : > { %3682 = vst.msk [vmem:[%s5626_s23 + $0x3c0] sm:$0xff] %vm3561_vm2, %v3553_v2  ;;  %v4760_v31 = vpop.f32.mrb[186].mxu0 }
 0x396   : > { %v3556_v34 = vadd.f32 %v4760_v31, %v5618_v35  ;;  %v3402_v9 = vpop.f32.mrb[187].mxu0 }
 0x397   : > { %v3555_v62 = vadd.f32 %v5618_v35, %v3402_v9 }
 0x398   : > { %3685 = vst.msk [vmem:[%s5626_s23 + $0x3d8] sm:$0xff] %vm3561_vm2, %v3556_v34 }
 0x399   : > { %3684 = vst.msk [vmem:[%s5626_s23 + $0x3d0] sm:$0xff] %vm3561_vm2, %v3555_v62  ;;  %v4763_v17 = vpop.f32.mrb[188].mxu0 }
 0x39a   : > { %v3558_v1 = vadd.f32 %v4763_v17, %v5618_v35  ;;  %v3412_v29 = vpop.f32.mrb[189].mxu0 }
 0x39b   : > { %v3557_v33 = vadd.f32 %v5618_v35, %v3412_v29 }
 0x39c   : > { %3687 = vst.msk [vmem:[%s5626_s23 + $0x3e8] sm:$0xff] %vm3561_vm2, %v3558_v1 }
 0x39d   : > { %3686 = vst.msk [vmem:[%s5626_s23 + $0x3e0] sm:$0xff] %vm3561_vm2, %v3557_v33  ;;  %v4766_v59 = vpop.f32.mrb[190].mxu0 }
 0x39e   : > { %v3560_v63 = vadd.f32 %v4766_v59, %v5618_v35  ;;  %v3422_v28 = vpop.f32.mrb[191].mxu0 }
 0x39f   : > { %v3559_v4 = vadd.f32 %v5618_v35, %v3422_v28 }
 0x3a0   : > { %3689 = vst.msk [vmem:[%s5626_s23 + $0x3f8] sm:$0xff] %vm3561_vm2, %v3560_v63 }
 0x3a1   : > { %3688 = vst.msk [vmem:[%s5626_s23 + $0x3f0] sm:$0xff] %vm3561_vm2, %v3559_v4 }
 0x3a2 PF: > { %s18_s26 = sadd.s32 1, %s4808_s26  }
 0x3a3   : > { %p15_p4 = scmp.ge.s32.totalorder %s18_s26, 4  }
 0x3a5   :  { %17 = sbr.rel (!%p15_p4) target bundleno = 2 (0x2), region = 78 }

</bundles_post_ra>
